<compile_context>
chip_gen: v7x
topology: tpu7x:2x2x1
jax: 0.10.0
libtpu: 0.0.40
codegen_flags: <defaults>
</compile_context>

<pallas_src>
import numpy as np
import jax
import jax.numpy as jnp
from jax import lax
from jax.experimental import pallas as pl
from jax.experimental.pallas import tpu as pltpu


def _round_up(v, m):
    return ((v + m - 1) // m) * m


def _pick_row_tile(H, W, cin, planes, cout, itemsize):
    """Largest divisor of H whose per-block working set fits a conservative
    VMEM activation budget (leaves room for double-buffered in/out blocks)."""
    budget = 8 * 1024 * 1024
    wp = _round_up(W + 2, 8)
    best = 1
    for th in range(1, H + 1):
        if H % th:
            continue
        halo_pix = (th + 2) * wp
        out_pix = th * W
        est = (halo_pix * (cin * itemsize + planes * (4 + itemsize))
               + out_pix * (9 * planes * itemsize + planes * 4
                            + cout * (4 + itemsize) + cin * itemsize))
        if est <= budget:
            best = th
    return best


def _make_kernel(H, W, TH, compute_dtype):
    W2p = _round_up(W + 2, 8)     # padded (and lane-friendly) width
    TH2 = TH + 2                  # row tile + 1-row halo on each side
    R = H // TH                   # number of row tiles

    def kernel(xi_ref, xh_ref, w1_ref, w2_ref, w3_ref,
               s1_ref, b1_ref, s2_ref, b2_ref, s3_ref, b3_ref, o_ref):
        r = pl.program_id(1)

        xi = xi_ref[0]                       # (TH,  W2p, Cin)  interior rows
        xh = xh_ref[0]                       # (2,   W2p, Cin)  top/bottom halo rows
        xfull = jnp.concatenate([xh[0:1], xi, xh[1:2]], axis=0)   # (TH2, W2p, Cin)

        # ---- conv1 (1x1) + bn1 + relu (f32 accumulation) -------------------
        x2d = xfull.reshape(TH2 * W2p, -1)
        h1 = jnp.dot(x2d, w1_ref[...], preferred_element_type=jnp.float32)
        h1 = jnp.maximum(h1 * s1_ref[...] + b1_ref[...], 0.0)
        h1 = h1.reshape(TH2, W2p, -1)        # (TH2, W2p, planes), f32

        # zero out the 3x3 conv's zero-padding region (image border):
        #   columns 0 and > W are always padding,
        cid = lax.broadcasted_iota(jnp.int32, h1.shape, 1)
        h1 = jnp.where((cid >= 1) & (cid <= W), h1, 0.0)
        #   halo rows are padding only on the first / last row tile.
        top = jnp.where(r == 0, 0.0, 1.0)
        bot = jnp.where(r == R - 1, 0.0, 1.0)
        h1 = jnp.concatenate(
            [h1[0:1] * top, h1[1:TH + 1], h1[TH + 1:TH + 2] * bot], axis=0)
        h1 = h1.astype(compute_dtype)

        # ---- conv2 (3x3, pad=1, stride=1) as ONE matmul, K = 9*planes ------
        taps = [h1[dy:dy + TH, dx:dx + W, :]
                for dy in range(3) for dx in range(3)]
        cat = jnp.concatenate(taps, axis=-1).reshape(TH * W, -1)  # (TH*W, 9*planes)
        h2 = jnp.dot(cat, w2_ref[...], preferred_element_type=jnp.float32)
        h2 = jnp.maximum(h2 * s2_ref[...] + b2_ref[...], 0.0)
        h2 = h2.astype(compute_dtype)                              # (TH*W, planes)

        # ---- conv3 (1x1) + bn3 + residual add + relu -----------------------
        h3 = jnp.dot(h2, w3_ref[...], preferred_element_type=jnp.float32)
        ident = xi[:, 1:W + 1, :].reshape(TH * W, -1).astype(jnp.float32)
        out = jnp.maximum(h3 * s3_ref[...] + b3_ref[...] + ident, 0.0)
        o_ref[0] = out.reshape(TH, W, -1).astype(o_ref.dtype)

    return kernel


def bottleneck_pallas_nhwc(x_nhwc, params, *, row_tile=None,
                           compute_dtype=jnp.bfloat16):
    """x_nhwc: (N, H, W, Cin).  Returns (N, H, W, Cout) in compute_dtype."""
    N, H, W, Cin = x_nhwc.shape
    w1k, w2k, w3k, s1, b1, s2, b2, s3, b3 = params
    planes = w1k.shape[1]
    Cout = w3k.shape[-1]
    assert Cout == Cin, "downsample=None requires inplanes == planes*expansion"

    cd = jnp.dtype(compute_dtype)
    if row_tile is None:
        row_tile = _pick_row_tile(H, W, Cin, planes, Cout, cd.itemsize)
    TH = row_tile
    assert H % TH == 0, "row_tile must divide H"
    R = H // TH
    W2p = _round_up(W + 2, 8)
    rpad = W2p - W - 1

    # Column-padded interior rows and per-tile halo rows (built once, outside).
    xc = jnp.pad(x_nhwc, ((0, 0), (0, 0), (1, rpad), (0, 0))).astype(cd)
    xp = jnp.pad(x_nhwc, ((0, 0), (1, 1), (1, rpad), (0, 0))).astype(cd)
    top_idx = jnp.arange(R) * TH                 # padded-row index of top halo
    bot_idx = top_idx + TH + 1                   # padded-row index of bottom halo
    halo_idx = jnp.stack([top_idx, bot_idx], axis=1).reshape(-1)   # (2R,)
    xh = jnp.take(xp, halo_idx, axis=1)          # (N, 2R, W2p, Cin)

    w1c = w1k.astype(cd)
    w2c = w2k.astype(cd)                         # (9*planes, planes)
    w3c = w3k.astype(cd)

    def full(arr):
        nd = arr.ndim
        return pl.BlockSpec(arr.shape, lambda n, r: (0,) * nd)

    out = pl.pallas_call(
        _make_kernel(H, W, TH, cd),
        out_shape=jax.ShapeDtypeStruct((N, H, W, Cout), cd),
        grid=(N, R),
        in_specs=[
            pl.BlockSpec((1, TH, W2p, Cin), lambda n, r: (n, r, 0, 0)),  # interior
            pl.BlockSpec((1, 2, W2p, Cin), lambda n, r: (n, r, 0, 0)),   # halo rows
            full(w1c), full(w2c), full(w3c),
            full(s1), full(b1), full(s2), full(b2), full(s3), full(b3),
        ],
        out_specs=pl.BlockSpec((1, TH, W, Cout), lambda n, r: (n, r, 0, 0)),
        compiler_params=pltpu.CompilerParams(
            dimension_semantics=("parallel", "parallel"),
            vmem_limit_bytes=48 * 1024 * 1024),
    )(xc, xh, w1c, w2c, w3c, s1, b1, s2, b2, s3, b3)
    return out


def bottleneck_pallas(x_nchw, params, *, row_tile=None,
                      compute_dtype=jnp.bfloat16):
    """PyTorch-interface wrapper: (N, Cin, H, W) f32 -> (N, Cout, H, W) f32.
    The NCHW<->NHWC transposes live outside the kernel; a full NHWC network
    should call bottleneck_pallas_nhwc directly and skip them."""
    x_nhwc = jnp.transpose(x_nchw, (0, 2, 3, 1))
    out = bottleneck_pallas_nhwc(x_nhwc, params, row_tile=row_tile,
                                 compute_dtype=compute_dtype)
    return jnp.transpose(out, (0, 3, 1, 2)).astype(jnp.float32)


# --------------------------- reference (pure JAX) ---------------------------
def _conv2d_nchw(x, w, stride=1, padding=0):
    return lax.conv_general_dilated(
        x, w, window_strides=(stride, stride),
        padding=[(padding, padding), (padding, padding)],
        dimension_numbers=("NCHW", "OIHW", "NCHW"))


def _bn(x, gamma, beta, mean, var, eps=1e-5):
    inv = gamma / jnp.sqrt(var + eps)
    return x * inv[None, :, None, None] + (beta - mean * inv)[None, :, None, None]


def bottleneck_reference(x, raw):
    (W1, g1, be1, m1, v1,
     W2, b2c, g2, be2, m2, v2,
     W3, g3, be3, m3, v3) = raw
    out = jnp.maximum(_bn(_conv2d_nchw(x, W1), g1, be1, m1, v1), 0.0)
    out = _conv2d_nchw(out, W2, stride=1, padding=1) + b2c[None, :, None, None]
    out = jnp.maximum(_bn(out, g2, be2, m2, v2), 0.0)
    out = _bn(_conv2d_nchw(out, W3), g3, be3, m3, v3)
    return jnp.maximum(out + x, 0.0)


# ------------------------------ parameter setup -----------------------------
def make_params(key, inplanes, planes, expansion=4, eps=1e-5):
    ks = jax.random.split(key, 16)
    f = jnp.float32
    W1 = (jax.random.normal(ks[0], (planes, inplanes, 1, 1)) * 0.1).astype(f)
    W2 = (jax.random.normal(ks[1], (planes, planes, 3, 3)) * 0.1).astype(f)
    b2c = (jax.random.normal(ks[2], (planes,)) * 0.1).astype(f)
    W3 = (jax.random.normal(ks[3], (planes * expansion, planes, 1, 1)) * 0.1).astype(f)

    def bn(k, c):
        k1, k2, k3, k4 = jax.random.split(k, 4)
        gamma = jax.random.uniform(k1, (c,), minval=0.5, maxval=1.5).astype(f)
        beta = (jax.random.normal(k2, (c,)) * 0.1).astype(f)
        mean = (jax.random.normal(k3, (c,)) * 0.1).astype(f)
        var = jax.random.uniform(k4, (c,), minval=0.5, maxval=1.5).astype(f)
        return gamma, beta, mean, var

    g1, be1, m1, v1 = bn(ks[4], planes)
    g2, be2, m2, v2 = bn(ks[5], planes)
    g3, be3, m3, v3 = bn(ks[6], planes * expansion)

    raw = (W1, g1, be1, m1, v1, W2, b2c, g2, be2, m2, v2, W3, g3, be3, m3, v3)

    # Folded / kernel-layout params.
    w1k = W1[:, :, 0, 0].T                                        # (Cin, planes)
    w2k = jnp.stack([W2[:, :, dy, dx].T                           # (9*planes, planes)
                     for dy in range(3) for dx in range(3)]).reshape(9 * planes, planes)
    w3k = W3[:, :, 0, 0].T                                        # (planes, 4*planes)

    inv1 = g1 / jnp.sqrt(v1 + eps)
    inv2 = g2 / jnp.sqrt(v2 + eps)
    inv3 = g3 / jnp.sqrt(v3 + eps)
    s1, b1 = inv1[None, :], (be1 - m1 * inv1)[None, :]
    s2, b2 = inv2[None, :], (be2 + (b2c - m2) * inv2)[None, :]
    s3, b3 = inv3[None, :], (be3 - m3 * inv3)[None, :]

    kernel_params = (w1k, w2k, w3k, s1, b1, s2, b2, s3, b3)
    return kernel_params, raw


if __name__ == "__main__":
    # Small shapes: batch=2, inplanes=16, planes=4 (expansion 4 -> out=16), 8x8.
    N, inplanes, planes, H, W = 2, 16, 4, 8, 8

    key = jax.random.PRNGKey(0)
    kx, kp = jax.random.split(key)
    x = jax.random.normal(kx, (N, inplanes, H, W), dtype=jnp.float32)

    kernel_params, raw_params = make_params(kp, inplanes, planes)
    ref = jax.block_until_ready(bottleneck_reference(x, raw_params))

    # (compute dtype, row tile, tolerance): f32 paths check exactness (single and
    # multi row-tile, exercising halo handling); bf16 path checks the MXU-rate path.
    configs = [
        (jnp.float32, None, 2e-4),
        (jnp.float32, 4, 2e-4),
        (jnp.bfloat16, 4, 5e-2),
    ]
    for dtype, rt, tol in configs:
        out = bottleneck_pallas(x, kernel_params, row_tile=rt, compute_dtype=dtype)
        out = jax.block_until_ready(out)
        assert out.shape == (N, planes * 4, H, W)
        assert np.allclose(np.asarray(out), np.asarray(ref), rtol=tol, atol=tol), \
            f"Pallas kernel does not match reference (dtype={dtype}, row_tile={rt})"

    print("KERNEL_OK")
</pallas_src>

<mosaic_0001>
module attributes {stable_mosaic.version = 11 : i64} {
  func.func @kernel(%arg0: i32, %arg1: i32, %arg2: memref<1x8x16x16xf32, #tpu.memory_space<vmem>>, %arg3: memref<1x2x16x16xf32, #tpu.memory_space<vmem>>, %arg4: memref<16x4xf32, #tpu.memory_space<vmem>>, %arg5: memref<36x4xf32, #tpu.memory_space<vmem>>, %arg6: memref<4x16xf32, #tpu.memory_space<vmem>>, %arg7: memref<1x4xf32, #tpu.memory_space<vmem>>, %arg8: memref<1x4xf32, #tpu.memory_space<vmem>>, %arg9: memref<1x4xf32, #tpu.memory_space<vmem>>, %arg10: memref<1x4xf32, #tpu.memory_space<vmem>>, %arg11: memref<1x16xf32, #tpu.memory_space<vmem>>, %arg12: memref<1x16xf32, #tpu.memory_space<vmem>>, %arg13: memref<1x8x8x16xf32, #tpu.memory_space<vmem>>) attributes {dimension_semantics = [#tpu.dimension_semantics<parallel>, #tpu.dimension_semantics<parallel>], iteration_bounds = array<i64: 2, 1>, scalar_prefetch = 0 : i64, scratch_operands = 0 : i64, tpu.core_type = #tpu.core_type<tc>, window_params = [{transform_indices = @transform_0, window_bounds = array<i64: 1, 8, 16, 16>}, {transform_indices = @transform_1, window_bounds = array<i64: 1, 2, 16, 16>}, {pipeline_mode = #tpu.pipeline_mode<synchronous>, transform_indices = @transform_2, window_bounds = array<i64: 16, 4>}, {pipeline_mode = #tpu.pipeline_mode<synchronous>, transform_indices = @transform_3, window_bounds = array<i64: 36, 4>}, {pipeline_mode = #tpu.pipeline_mode<synchronous>, transform_indices = @transform_4, window_bounds = array<i64: 4, 16>}, {pipeline_mode = #tpu.pipeline_mode<synchronous>, transform_indices = @transform_5, window_bounds = array<i64: 1, 4>}, {pipeline_mode = #tpu.pipeline_mode<synchronous>, transform_indices = @transform_6, window_bounds = array<i64: 1, 4>}, {pipeline_mode = #tpu.pipeline_mode<synchronous>, transform_indices = @transform_7, window_bounds = array<i64: 1, 4>}, {pipeline_mode = #tpu.pipeline_mode<synchronous>, transform_indices = @transform_8, window_bounds = array<i64: 1, 4>}, {pipeline_mode = #tpu.pipeline_mode<synchronous>, transform_indices = @transform_9, window_bounds = array<i64: 1, 16>}, {pipeline_mode = #tpu.pipeline_mode<synchronous>, transform_indices = @transform_10, window_bounds = array<i64: 1, 16>}, {transform_indices = @transform_11, window_bounds = array<i64: 1, 8, 8, 16>}]} {
    %c0 = arith.constant 0 : index
    %c0_0 = arith.constant 0 : index
    %c0_1 = arith.constant 0 : index
    %c0_2 = arith.constant 0 : index
    %0 = vector.load %arg2[%c0, %c0_0, %c0_1, %c0_2] : memref<1x8x16x16xf32, #tpu.memory_space<vmem>>, vector<1x8x16x16xf32>
    %1 = vector.shape_cast %0 : vector<1x8x16x16xf32> to vector<8x16x16xf32>
    %c0_3 = arith.constant 0 : index
    %c0_4 = arith.constant 0 : index
    %c0_5 = arith.constant 0 : index
    %c0_6 = arith.constant 0 : index
    %2 = vector.load %arg3[%c0_3, %c0_4, %c0_5, %c0_6] : memref<1x2x16x16xf32, #tpu.memory_space<vmem>>, vector<1x2x16x16xf32>
    %3 = vector.shape_cast %2 : vector<1x2x16x16xf32> to vector<2x16x16xf32>
    %4 = vector.extract_strided_slice %3 {offsets = [0, 0, 0], sizes = [1, 16, 16], strides = [1, 1, 1]} : vector<2x16x16xf32> to vector<1x16x16xf32>
    %5 = vector.extract_strided_slice %3 {offsets = [1, 0, 0], sizes = [1, 16, 16], strides = [1, 1, 1]} : vector<2x16x16xf32> to vector<1x16x16xf32>
    %6 = tpu.concatenate %4, %1, %5 in 0 : vector<1x16x16xf32>, vector<8x16x16xf32>, vector<1x16x16xf32> -> vector<10x16x16xf32>
    %7 = vector.shape_cast %6 : vector<10x16x16xf32> to vector<160x16xf32>
    %c0_7 = arith.constant 0 : index
    %c0_8 = arith.constant 0 : index
    %8 = vector.load %arg4[%c0_7, %c0_8] : memref<16x4xf32, #tpu.memory_space<vmem>>, vector<16x4xf32>
    %cst = arith.constant dense<0.000000e+00> : vector<160x4xf32>
    %9 = tpu.matmul %7, %8, %cst {dimension_numbers = #tpu.dot_dimension_numbers<[1], [0], [0], [1], [0, 0, 1, 1], [], []>} : vector<160x16xf32>, vector<16x4xf32>, vector<160x4xf32> -> vector<160x4xf32>
    %c0_9 = arith.constant 0 : index
    %c0_10 = arith.constant 0 : index
    %10 = vector.load %arg7[%c0_9, %c0_10] : memref<1x4xf32, #tpu.memory_space<vmem>>, vector<1x4xf32>
    %11 = vector.broadcast %10 : vector<1x4xf32> to vector<160x4xf32>
    %12 = arith.mulf %9, %11 : vector<160x4xf32>
    %c0_11 = arith.constant 0 : index
    %c0_12 = arith.constant 0 : index
    %13 = vector.load %arg8[%c0_11, %c0_12] : memref<1x4xf32, #tpu.memory_space<vmem>>, vector<1x4xf32>
    %14 = vector.broadcast %13 : vector<1x4xf32> to vector<160x4xf32>
    %15 = arith.addf %12, %14 : vector<160x4xf32>
    %cst_13 = arith.constant 0.000000e+00 : f32
    %16 = vector.broadcast %cst_13 : f32 to vector<160x4xf32>
    %17 = arith.maximumf %15, %16 : vector<160x4xf32>
    %18 = vector.shape_cast %17 : vector<160x4xf32> to vector<10x16x4xf32>
    %19 = tpu.iota {dimensions = array<i32: 1>} : vector<10x16x4xi32>
    %c1_i32 = arith.constant 1 : i32
    %20 = vector.broadcast %c1_i32 : i32 to vector<10x16x4xi32>
    %21 = arith.cmpi sge, %19, %20 : vector<10x16x4xi32>
    %c8_i32 = arith.constant 8 : i32
    %22 = vector.broadcast %c8_i32 : i32 to vector<10x16x4xi32>
    %23 = arith.cmpi sle, %19, %22 : vector<10x16x4xi32>
    %24 = arith.andi %21, %23 : vector<10x16x4xi1>
    %cst_14 = arith.constant 0.000000e+00 : f32
    %25 = vector.broadcast %cst_14 : f32 to vector<10x16x4xf32>
    %26 = arith.select %24, %18, %25 : vector<10x16x4xi1>, vector<10x16x4xf32>
    %c0_i32 = arith.constant 0 : i32
    %27 = arith.cmpi eq, %arg1, %c0_i32 : i32
    %cst_15 = arith.constant 0.000000e+00 : f32
    %cst_16 = arith.constant 1.000000e+00 : f32
    %28 = arith.select %27, %cst_15, %cst_16 : f32
    %c0_i32_17 = arith.constant 0 : i32
    %29 = arith.cmpi eq, %arg1, %c0_i32_17 : i32
    %cst_18 = arith.constant 0.000000e+00 : f32
    %cst_19 = arith.constant 1.000000e+00 : f32
    %30 = arith.select %29, %cst_18, %cst_19 : f32
    %31 = vector.extract_strided_slice %26 {offsets = [0, 0, 0], sizes = [1, 16, 4], strides = [1, 1, 1]} : vector<10x16x4xf32> to vector<1x16x4xf32>
    %32 = vector.broadcast %28 : f32 to vector<1x16x4xf32>
    %33 = arith.mulf %31, %32 : vector<1x16x4xf32>
    %34 = vector.extract_strided_slice %26 {offsets = [1, 0, 0], sizes = [8, 16, 4], strides = [1, 1, 1]} : vector<10x16x4xf32> to vector<8x16x4xf32>
    %35 = vector.extract_strided_slice %26 {offsets = [9, 0, 0], sizes = [1, 16, 4], strides = [1, 1, 1]} : vector<10x16x4xf32> to vector<1x16x4xf32>
    %36 = vector.broadcast %30 : f32 to vector<1x16x4xf32>
    %37 = arith.mulf %35, %36 : vector<1x16x4xf32>
    %38 = tpu.concatenate %33, %34, %37 in 0 : vector<1x16x4xf32>, vector<8x16x4xf32>, vector<1x16x4xf32> -> vector<10x16x4xf32>
    %39 = vector.extract_strided_slice %38 {offsets = [0, 0, 0], sizes = [8, 8, 4], strides = [1, 1, 1]} : vector<10x16x4xf32> to vector<8x8x4xf32>
    %40 = vector.extract_strided_slice %38 {offsets = [0, 1, 0], sizes = [8, 8, 4], strides = [1, 1, 1]} : vector<10x16x4xf32> to vector<8x8x4xf32>
    %41 = vector.extract_strided_slice %38 {offsets = [0, 2, 0], sizes = [8, 8, 4], strides = [1, 1, 1]} : vector<10x16x4xf32> to vector<8x8x4xf32>
    %42 = vector.extract_strided_slice %38 {offsets = [1, 0, 0], sizes = [8, 8, 4], strides = [1, 1, 1]} : vector<10x16x4xf32> to vector<8x8x4xf32>
    %43 = vector.extract_strided_slice %38 {offsets = [1, 1, 0], sizes = [8, 8, 4], strides = [1, 1, 1]} : vector<10x16x4xf32> to vector<8x8x4xf32>
    %44 = vector.extract_strided_slice %38 {offsets = [1, 2, 0], sizes = [8, 8, 4], strides = [1, 1, 1]} : vector<10x16x4xf32> to vector<8x8x4xf32>
    %45 = vector.extract_strided_slice %38 {offsets = [2, 0, 0], sizes = [8, 8, 4], strides = [1, 1, 1]} : vector<10x16x4xf32> to vector<8x8x4xf32>
    %46 = vector.extract_strided_slice %38 {offsets = [2, 1, 0], sizes = [8, 8, 4], strides = [1, 1, 1]} : vector<10x16x4xf32> to vector<8x8x4xf32>
    %47 = vector.extract_strided_slice %38 {offsets = [2, 2, 0], sizes = [8, 8, 4], strides = [1, 1, 1]} : vector<10x16x4xf32> to vector<8x8x4xf32>
    %48 = tpu.concatenate %39, %40, %41, %42, %43, %44, %45, %46, %47 in 2 : vector<8x8x4xf32>, vector<8x8x4xf32>, vector<8x8x4xf32>, vector<8x8x4xf32>, vector<8x8x4xf32>, vector<8x8x4xf32>, vector<8x8x4xf32>, vector<8x8x4xf32>, vector<8x8x4xf32> -> vector<8x8x36xf32>
    %49 = vector.shape_cast %48 : vector<8x8x36xf32> to vector<64x36xf32>
    %c0_20 = arith.constant 0 : index
    %c0_21 = arith.constant 0 : index
    %50 = vector.load %arg5[%c0_20, %c0_21] : memref<36x4xf32, #tpu.memory_space<vmem>>, vector<36x4xf32>
    %cst_22 = arith.constant dense<0.000000e+00> : vector<64x4xf32>
    %51 = tpu.matmul %49, %50, %cst_22 {dimension_numbers = #tpu.dot_dimension_numbers<[1], [0], [0], [1], [0, 0, 1, 1], [], []>} : vector<64x36xf32>, vector<36x4xf32>, vector<64x4xf32> -> vector<64x4xf32>
    %c0_23 = arith.constant 0 : index
    %c0_24 = arith.constant 0 : index
    %52 = vector.load %arg9[%c0_23, %c0_24] : memref<1x4xf32, #tpu.memory_space<vmem>>, vector<1x4xf32>
    %53 = vector.broadcast %52 : vector<1x4xf32> to vector<64x4xf32>
    %54 = arith.mulf %51, %53 : vector<64x4xf32>
    %c0_25 = arith.constant 0 : index
    %c0_26 = arith.constant 0 : index
    %55 = vector.load %arg10[%c0_25, %c0_26] : memref<1x4xf32, #tpu.memory_space<vmem>>, vector<1x4xf32>
    %56 = vector.broadcast %55 : vector<1x4xf32> to vector<64x4xf32>
    %57 = arith.addf %54, %56 : vector<64x4xf32>
    %cst_27 = arith.constant 0.000000e+00 : f32
    %58 = vector.broadcast %cst_27 : f32 to vector<64x4xf32>
    %59 = arith.maximumf %57, %58 : vector<64x4xf32>
    %c0_28 = arith.constant 0 : index
    %c0_29 = arith.constant 0 : index
    %60 = vector.load %arg6[%c0_28, %c0_29] : memref<4x16xf32, #tpu.memory_space<vmem>>, vector<4x16xf32>
    %cst_30 = arith.constant dense<0.000000e+00> : vector<64x16xf32>
    %61 = tpu.matmul %59, %60, %cst_30 {dimension_numbers = #tpu.dot_dimension_numbers<[1], [0], [0], [1], [0, 0, 1, 1], [], []>} : vector<64x4xf32>, vector<4x16xf32>, vector<64x16xf32> -> vector<64x16xf32>
    %62 = vector.extract_strided_slice %1 {offsets = [0, 1, 0], sizes = [8, 8, 16], strides = [1, 1, 1]} : vector<8x16x16xf32> to vector<8x8x16xf32>
    %63 = vector.shape_cast %62 : vector<8x8x16xf32> to vector<64x16xf32>
    %c0_31 = arith.constant 0 : index
    %c0_32 = arith.constant 0 : index
    %64 = vector.load %arg11[%c0_31, %c0_32] : memref<1x16xf32, #tpu.memory_space<vmem>>, vector<1x16xf32>
    %65 = vector.broadcast %64 : vector<1x16xf32> to vector<64x16xf32>
    %66 = arith.mulf %61, %65 : vector<64x16xf32>
    %c0_33 = arith.constant 0 : index
    %c0_34 = arith.constant 0 : index
    %67 = vector.load %arg12[%c0_33, %c0_34] : memref<1x16xf32, #tpu.memory_space<vmem>>, vector<1x16xf32>
    %68 = vector.broadcast %67 : vector<1x16xf32> to vector<64x16xf32>
    %69 = arith.addf %66, %68 : vector<64x16xf32>
    %70 = arith.addf %69, %63 : vector<64x16xf32>
    %cst_35 = arith.constant 0.000000e+00 : f32
    %71 = vector.broadcast %cst_35 : f32 to vector<64x16xf32>
    %72 = arith.maximumf %70, %71 : vector<64x16xf32>
    %73 = vector.shape_cast %72 : vector<64x16xf32> to vector<8x8x16xf32>
    %c0_36 = arith.constant 0 : index
    %c0_37 = arith.constant 0 : index
    %c0_38 = arith.constant 0 : index
    %c0_39 = arith.constant 0 : index
    %74 = vector.load %arg13[%c0_36, %c0_37, %c0_38, %c0_39] : memref<1x8x8x16xf32, #tpu.memory_space<vmem>>, vector<1x8x8x16xf32>
    %75 = vector.shape_cast %74 : vector<1x8x8x16xf32> to vector<8x8x16xf32>
    %76 = vector.shape_cast %73 : vector<8x8x16xf32> to vector<1x8x8x16xf32>
    tpu.vector_store %arg13[%c0_36, %c0_37, %c0_38, %c0_39], %76 {strides = array<i32>} : memref<1x8x8x16xf32, #tpu.memory_space<vmem>>, vector<1x8x8x16xf32>,
    return
  }
  func.func @transform_0(%arg0: i32, %arg1: i32) -> (i32, i32, i32, i32) {
    %c0_i32 = arith.constant 0 : i32
    %c0_i32_0 = arith.constant 0 : i32
    %c0_i32_1 = arith.constant 0 : i32
    return %arg0, %arg1, %c0_i32, %c0_i32_0 : i32, i32, i32, i32
  }
  func.func @transform_1(%arg0: i32, %arg1: i32) -> (i32, i32, i32, i32) {
    %c0_i32 = arith.constant 0 : i32
    %c0_i32_0 = arith.constant 0 : i32
    %c0_i32_1 = arith.constant 0 : i32
    return %arg0, %arg1, %c0_i32, %c0_i32_0 : i32, i32, i32, i32
  }
  func.func @transform_2(%arg0: i32, %arg1: i32) -> (i32, i32) {
    %c0_i32 = arith.constant 0 : i32
    %c0_i32_0 = arith.constant 0 : i32
    %c0_i32_1 = arith.constant 0 : i32
    return %c0_i32, %c0_i32_0 : i32, i32
  }
  func.func @transform_3(%arg0: i32, %arg1: i32) -> (i32, i32) {
    %c0_i32 = arith.constant 0 : i32
    %c0_i32_0 = arith.constant 0 : i32
    %c0_i32_1 = arith.constant 0 : i32
    return %c0_i32, %c0_i32_0 : i32, i32
  }
  func.func @transform_4(%arg0: i32, %arg1: i32) -> (i32, i32) {
    %c0_i32 = arith.constant 0 : i32
    %c0_i32_0 = arith.constant 0 : i32
    %c0_i32_1 = arith.constant 0 : i32
    return %c0_i32, %c0_i32_0 : i32, i32
  }
  func.func @transform_5(%arg0: i32, %arg1: i32) -> (i32, i32) {
    %c0_i32 = arith.constant 0 : i32
    %c0_i32_0 = arith.constant 0 : i32
    %c0_i32_1 = arith.constant 0 : i32
    return %c0_i32, %c0_i32_0 : i32, i32
  }
  func.func @transform_6(%arg0: i32, %arg1: i32) -> (i32, i32) {
    %c0_i32 = arith.constant 0 : i32
    %c0_i32_0 = arith.constant 0 : i32
    %c0_i32_1 = arith.constant 0 : i32
    return %c0_i32, %c0_i32_0 : i32, i32
  }
  func.func @transform_7(%arg0: i32, %arg1: i32) -> (i32, i32) {
    %c0_i32 = arith.constant 0 : i32
    %c0_i32_0 = arith.constant 0 : i32
    %c0_i32_1 = arith.constant 0 : i32
    return %c0_i32, %c0_i32_0 : i32, i32
  }
  func.func @transform_8(%arg0: i32, %arg1: i32) -> (i32, i32) {
    %c0_i32 = arith.constant 0 : i32
    %c0_i32_0 = arith.constant 0 : i32
    %c0_i32_1 = arith.constant 0 : i32
    return %c0_i32, %c0_i32_0 : i32, i32
  }
  func.func @transform_9(%arg0: i32, %arg1: i32) -> (i32, i32) {
    %c0_i32 = arith.constant 0 : i32
    %c0_i32_0 = arith.constant 0 : i32
    %c0_i32_1 = arith.constant 0 : i32
    return %c0_i32, %c0_i32_0 : i32, i32
  }
  func.func @transform_10(%arg0: i32, %arg1: i32) -> (i32, i32) {
    %c0_i32 = arith.constant 0 : i32
    %c0_i32_0 = arith.constant 0 : i32
    %c0_i32_1 = arith.constant 0 : i32
    return %c0_i32, %c0_i32_0 : i32, i32
  }
  func.func @transform_11(%arg0: i32, %arg1: i32) -> (i32, i32, i32, i32) {
    %c0_i32 = arith.constant 0 : i32
    %c0_i32_0 = arith.constant 0 : i32
    %c0_i32_1 = arith.constant 0 : i32
    return %arg0, %arg1, %c0_i32, %c0_i32_0 : i32, i32, i32, i32
  }
}

</mosaic_0001>

<bundles_post_ra>
// kernel: tpu_custom_call.1
= control target key start
LH: loop header
LB: loop body
LE: loop exit
PB: predicated region body
PF: predicated region fallthrough
CT: control target
= control target key end

     0   :  { %16 = vsyncpa [#allocation3], 0  ;;  %s2878_s0 = inlined_call_operand.hbm [shape: f32[2,8,16,16], index: 0, kind: input, shape index: {}]   ;;  %s2879_s1 = inlined_call_operand.vmem [shape: f32[2,2,16,16], index: 1, kind: input, shape index: {}]   ;;  %s2880_s2 = inlined_call_operand.vmem [shape: f32[16,4], index: 2, kind: input, shape index: {}]   ;;  %s2881_s3 = inlined_call_operand.vmem [shape: f32[36,4], index: 3, kind: input, shape index: {}]   ;;  %s2882_s4 = inlined_call_operand.vmem [shape: f32[4,16], index: 4, kind: input, shape index: {}]   ;;  %s2883_s5 = inlined_call_operand.vmem [shape: f32[1,4], index: 5, kind: input, shape index: {}]   ;;  %s2884_s6 = inlined_call_operand.vmem [shape: f32[1,4], index: 6, kind: input, shape index: {}]   ;;  %s2885_s7 = inlined_call_operand.vmem [shape: f32[1,4], index: 7, kind: input, shape index: {}]   ;;  %s2886_s8 = inlined_call_operand.vmem [shape: f32[1,4], index: 8, kind: input, shape index: {}]   ;;  %s2887_s9 = inlined_call_operand.vmem [shape: f32[1,16], index: 9, kind: input, shape index: {}]   ;;  %s2888_s10 = inlined_call_operand.vmem [shape: f32[1,16], index: 10, kind: input, shape index: {}]   ;;  %s2889_s11 = inlined_call_operand.hbm [shape: f32[2,8,8,16], index: 11, kind: output, shape index: {}]  }
   0x1   :  { %18 = vsyncpa [#allocation3 + $0x1], 0 }
   0x2   :  { %19 = vsyncpa [#allocation4], 0 }
   0x3   :  { %21 = vsyncpa [#allocation4 + $0x1], 0  ;;  %s2138_s17 = smov 0   ;;  %s2140_s18 = smov 0  }
   0x4   :  { %s2142_s19 = smov 0   ;;  %s2144_s20 = smov 0  }
   0x5   :  { %s2146_s21 = smov 0   ;;  %s2148_s22 = smov 0  }
   0x6 LB: > { %2893 = sst [smem:[#allocation8_spill]] %s2059_s21  ;;  %s1688_s23 = sadd.s32 4294967295, %s2063_s22   ;;  %s2063_s22 = sphi %s2148_s22, %s27_s22   ;;  %s2059_s21 = sphi %s2146_s21, %s2907_s21   ;;  %s2055_s20 = sphi %s2144_s20, %s2906_s20   ;;  %s2051_s19 = sphi %s2142_s19, %s2910_s19   ;;  %s2047_s18 = sphi %s2140_s18, %s2909_s18   ;;  %s2043_s17 = sphi %s2138_s17, %s2908_s17  }
   0x7   : > { %s1689_s24 = sadd.s32 4294967294, %s2063_s22   ;;  %s39_s25 = sadd.s32 1, %s2059_s21 }
   0x8   : > { %s48_s26 = sadd.s32 1, %s2051_s19  ;;  %p41_p0 = scmp.ge.s32.totalorder %s39_s25, 2 }
   0x9   : > { %p55_p1 = scmp.ne.s32.totalorder %s2051_s19, %s2047_s18  ;;  %p56_p2 = scmp.eq.s32.totalorder %s2063_s22, 0 }
   0xa   : > { %p61_p3 = scmp.ne.s32.totalorder %s2047_s18, %s2043_s17  ;;  %s2912_s25 = smov (%p41_p0, %s39_s25), 0 }
   0xb   : > { %2894 = sst [smem:[#allocation9_spill]] %s2912_s25  ;;  %p2179_p4 = por %p56_p2, %p55_p1 }
   0xc   : > { %p62_p5 = scmp.eq.s32.totalorder %s1688_s23, 0  ;;  %s43_s28 = ssub.s32 %s2059_s21, %s2912_s25 }
   0xd   : > { %p304_p6 = scmp.eq.s32.totalorder %s1688_s23, 1  ;;  %p46_p7 = scmp.eq.s32.totalorder %s43_s28, 0 }
   0xe   : > { %p2185_p8 = por %p62_p5, %p61_p3  ;;  %p310_p10 = scmp.eq.s32.totalorder %s1689_s24, 1 }
   0xf   : > { %p2189_p9 = por %p304_p6, %p55_p1  ;;  %p1890_p13 = scmp.lt.s32.totalorder %s2063_s22, 2 }
  0x10   : > { %s2194_s12 = scalar_select %p46_p7, %s2051_s19, %s48_s26  }
  0x11   : > { %s2897_s30 = scalar_select %p2189_p9, 1, 0 }
  0x12   : > { %2898 = sst [smem:[#allocation10_spill]] %s2194_s12  ;;  %p2196_p11 = por %p310_p10, %p61_p3 }
  0x13   : > { %s357_s14 = sand.u32 1, %s2051_s19   ;;  %s1749_s16 = sshll.u32 %s2059_s21, 11 }
  0x14   : > { %s2899_s13 = scalar_select %p2196_p11, 1, 0 }
  0x15   : > { %s1692_s15 = sshll.u32 %s357_s14, 7  ;;  %s2207_s25 = scalar_lea.hbm %s2878_s0, %s1749_s16 }
  0x16   : > { %s361_s24 = scalar_lea.vmem [#allocation2], %s1692_s15  ;;  %p2213_p0 = pnand %p1890_p13, %p2179_p4 }
  0x17   : > { %s371_s26 = sshll.u32 %s361_s24, 4  ;;  %s2218_s21 = scalar_lea.sflag [#allocation3], %s357_s14  ;;  %s2209_s26 = int_to_ptr.vmem [resolvable:$true] %s371_s26 }
  0x18   : > { %s1951_s16 = scalar_lea.hbm %s2207_s25, 2048  ;;  %p1953_p3 = pneg %p2213_p0 }
  0x19   : > { %p1952_p2 = scmp.ne.s32.totalorder %s2207_s25, %s1951_s16  ;;  %s1956_s27 = scalar_lea.hbm %s2878_s0, 4096 }
  0x1a   : > { %p1957_p4 = scmp.lt.u32.totalorder %s2207_s25, %s2878_s0  ;;  %p1958_p7 = scmp.lt.u32.totalorder %s1956_s27, %s1951_s16 }
  0x1b   : > { %p1954_p5 = pnand %p1953_p3, %p1952_p2  ;;  %p1960_p13 = scmp.lt.u32.totalorder %s1951_s16, %s2207_s25 }
  0x1c   : > { %p1959_p10 = por %p1958_p7, %p1957_p4 }
  0x1d   : > { %p1955_p6 = pneg %p1954_p5 }
  0x1e   : > { %p1961_p12 = por %p1960_p13, %p1959_p10 }
  0x20   : > { %p1962_p1 = pnand %p1961_p12, %p1955_p6 }
  0x22   : > { %1965 = shalt.err (!%p1962_p1)
}
  0x23   : > { %s1966_s14 = scalar_lea.vmem %s2209_s26, 2048  ;;  %s2065_s15 = smov [#allocation2]  }
  0x24   : > { %p1967_p2 = scmp.ne.s32.totalorder %s2209_s26, %s1966_s14  ;;  %s1971_s23 = sshll.u32 %s2065_s15, 4  ;;  %s1972_s23 = int_to_ptr.vmem [resolvable:$false] %s1971_s23 }
  0x25   : > { %s1973_s28 = scalar_lea.vmem %s1972_s23, 4096  ;;  %p1974_p9 = scmp.lt.s32.totalorder %s2209_s26, %s1972_s23 }
  0x26   : > { %p1969_p5 = pnand %p1967_p2, %p1953_p3  ;;  %p1975_p4 = scmp.lt.s32.totalorder %s1973_s28, %s1966_s14 }
  0x28   : > { %p1970_p11 = pneg %p1969_p5  ;;  %p1976_p7 = por %p1975_p4, %p1974_p9 }
  0x2a   : > { %p1977_p10 = pnand %p1976_p7, %p1970_p11 }
  0x2c   : > { %1980 = shalt.err (!%p1977_p10)
}
  0x2d   : > { %s2066_s16 = smov 128   ;;  %s2067_s27 = smov 8  }
  0x2e   : > { %1885 = dma.hbm_to_vmem [thread:$0]  (!%p2213_p0), %s2207_s25, 2048, %s2209_s26, %s2218_s21, %s2066_s16, %s2066_s16, %s2067_s27  }
  0x2f   : > { %p393_p12 = scmp.lt.s32.totalorder %s2063_s22, 3  ;;  %p2901_p1 = scmp.ge.s32.totalorder %s2063_s22, 1 }
  0x31   : > { %p394_p3 = pnand %p2901_p1, %p393_p12 }
  0x32   : > { %s2250_s24 = sand.u32 (!%p394_p3), 1, %s2047_s18  }
  0x33   : > { %397 = sbr.rel (%p394_p3) target bundleno = 988 (0x3dc), region = 64  ;;  %s1696_s14 = sshll.u32 (!%p394_p3), %s2250_s24, 7 }
  0x34   : > { %s400_s15 = scalar_lea.sflag (!%p394_p3), [#allocation3], %s2250_s24  ;;  %s2254_s23 = scalar_lea.vmem (!%p394_p3), [#allocation2], %s1696_s14 }
  0x3a   : > { %2034 = dma.done.wait (%p2185_p8), %s400_s15, 2048  }
  0x3b   : > { %2036 = vsyncadd (%p2185_p8), %s400_s15, 4294965248  ;;  %p454_p9 = scmp.lt.s32.totalorder %s2055_s20, 1  ;;  %vm487_vm0 = vcmask 130048   ;;  %v485_v0 = vld [vmem:[%s2880_s2] sm:$0xff]  ;;  %v486_v1 = vld [vmem:[%s2880_s2 + $0x8] sm:$0xff]  ;;  %v787_v23 = vlaneseq  ;;  %vm888_vm3 = vcmask 1045504  }
  0x3c   : > { %v1866_v3 = vpack.c.bf16 %v486_v1, %v485_v0  ;;  %v2277_v5 = vld [vmem:[%s2254_s23] sm:$0xff]  ;;  %v2283_v6 = vld [vmem:[%s2254_s23 + $0x8] sm:$0xff]  ;;  %v2286_v7 = vld [vmem:[%s2254_s23 + $0x10] sm:$0xff]  ;;  %s2068_s12 = smov 12   ;;  %vm839_vm4 = vcmask 1046528   ;;  %s2069_s26 = smov 8  }
  0x3d   : > { %s455_s21 = scalar_select %p454_p9, %s2055_s20, 1  ;;  %v2293_v8 = vld [vmem:[%s2254_s23 + $0x18] sm:$0xff]  ;;  %v2296_v9 = vld [vmem:[%s2254_s23 + $0x20] sm:$0xff]  ;;  %v2303_v10 = vld [vmem:[%s2254_s23 + $0x28] sm:$0xff]  ;;  %v2361_v24 = vshrl.u32 %v787_v23, 7  ;;  %vm1198_vm5 = vcmask 1043456  }
  0x3e   : > { %1867 = vmatprep.subr.bf16.mxu0 %v1866_v3  ;;  %v2306_v11 = vld [vmem:[%s2254_s23 + $0x30] sm:$0xff]  ;;  %v2313_v12 = vld [vmem:[%s2254_s23 + $0x38] sm:$0xff]  ;;  %v2316_v13 = vld [vmem:[%s2254_s23 + $0x40] sm:$0xff]  ;;  %s2071_s16 = smov 20   ;;  %s2072_s27 = smov 16   ;;  %vm1097_vm6 = vcmask 31744  }
  0x3f   : > { %s1750_s25 = sshll.u32 %s455_s21, 5  ;;  %1869 = vmatpush3.bf16.msra.mxu0 %v1866_v3  ;;  %v2323_v14 = vld [vmem:[%s2254_s23 + $0x48] sm:$0xff]  ;;  %v2326_v15 = vld [vmem:[%s2254_s23 + $0x50] sm:$0xff]  ;;  %v2333_v16 = vld [vmem:[%s2254_s23 + $0x58] sm:$0xff]  ;;  %v2374_v28 = vadd.s32 8, %v2361_v24  ;;  %vm790_vm2 = vcmp.ge.s32.totalorder %v2361_v24, 1 }
  0x40   : > { %s2265_s28 = scalar_lea.vmem %s2879_s1, %s1750_s25  ;;  %v2336_v17 = vld [vmem:[%s2254_s23 + $0x60] sm:$0xff]  ;;  %v2343_v18 = vld [vmem:[%s2254_s23 + $0x68] sm:$0xff]  ;;  %v2346_v19 = vld [vmem:[%s2254_s23 + $0x70] sm:$0xff]  ;;  %s2073_s29 = smov 24   ;;  %vm1106_vm7 = vcmask 64512   ;;  %vm1115_vm8 = vcmask 97280  }
  0x41   : > { %v481_v2 = vld [vmem:[%s2265_s28] sm:$0xff]  ;;  %v482_v4 = vld [vmem:[%s2265_s28 + $0x8] sm:$0xff]  ;;  %v2353_v20 = vld [vmem:[%s2254_s23 + $0x78] sm:$0xff]  ;;  %vm793_vm1 = vcmp.le.s32.totalorder %v2374_v28, 8  ;;  %s2074_s23 = smov 28   ;;  %s2075_s15 = smov 32  }
  0x42   : > { %1800 = vmatprep.mubr.msk.f32.mxu0 %vm487_vm0, %v481_v2  ;;  %v483_v21 = vld [vmem:[%s2265_s28 + $0x10] sm:$0xff]  ;;  %v484_v22 = vld [vmem:[%s2265_s28 + $0x18] sm:$0xff]  ;;  %v2366_v25 = vld [vmem:[%s2883_s5] ss:$0 sm:$0xff]  ;;  %s2070_s28 = smov 4   ;;  %vm1132_vm9 = vcmask 162816  }
  0x43   : > { %1801 = vmatmul.mubr.msk.f32.vlgmr.msra.gmra.mrb[0].mxu0 %vm487_vm0, %v482_v4  ;;  %v2371_v27 = vld [vmem:[%s2884_s6] ss:$0 sm:$0xff]  ;;  %vm1141_vm10 = vcmask 195584   ;;  %vm1150_vm11 = vcmask 228352   ;;  %vm1159_vm12 = vcmask 261120   ;;  %vm1173_vm13 = vcmask 293888  }
  0x44   : > { %1803 = vmatprep.mubr.msk.f32.mxu0 %vm487_vm0, %v2277_v5  ;;  %p2902_p11 = scmp.ne.s32.totalorder %s2897_s30, 0  ;;  %s2076_s14 = smov [#allocation5]  }
  0x47   : > { %1804 = vmatmul.mubr.msk.f32.gmra.mrb[2].mxu0 %vm487_vm0, %v2283_v6 }
  0x48   : > { %1806 = vmatprep.mubr.msk.f32.mxu0 %vm487_vm0, %v2286_v7 }
  0x4b   : > { %1807 = vmatmul.mubr.msk.f32.gmra.mrb[4].mxu0 %vm487_vm0, %v2293_v8 }
  0x4c   : > { %1809 = vmatprep.mubr.msk.f32.mxu0 %vm487_vm0, %v2296_v9 }
  0x4f   : > { %1810 = vmatmul.mubr.msk.f32.gmra.mrb[6].mxu0 %vm487_vm0, %v2303_v10 }
  0x50   : > { %1812 = vmatprep.mubr.msk.f32.mxu0 %vm487_vm0, %v2306_v11 }
  0x53   : > { %1813 = vmatmul.mubr.msk.f32.gmra.mrb[8].mxu0 %vm487_vm0, %v2313_v12 }
  0x54   : > { %1815 = vmatprep.mubr.msk.f32.mxu0 %vm487_vm0, %v2316_v13 }
  0x57   : > { %1816 = vmatmul.mubr.msk.f32.gmra.mrb[10].mxu0 %vm487_vm0, %v2323_v14 }
  0x58   : > { %1818 = vmatprep.mubr.msk.f32.mxu0 %vm487_vm0, %v2326_v15 }
  0x5b   : > { %1819 = vmatmul.mubr.msk.f32.gmra.mrb[12].mxu0 %vm487_vm0, %v2333_v16 }
  0x5c   : > { %1821 = vmatprep.mubr.msk.f32.mxu0 %vm487_vm0, %v2336_v17 }
  0x5f   : > { %1822 = vmatmul.mubr.msk.f32.gmra.mrb[14].mxu0 %vm487_vm0, %v2343_v18 }
  0x60   : > { %1824 = vmatprep.mubr.msk.f32.mxu0 %vm487_vm0, %v2346_v19 }
  0x63   : > { %1825 = vmatmul.mubr.msk.f32.gmra.mrb[16].mxu0 %vm487_vm0, %v2353_v20 }
  0x64   : > { %1827 = vmatprep.mubr.msk.f32.mxu0 %vm487_vm0, %v483_v21 }
  0x67   : > { %1828 = vmatmul.mubr.msk.f32.gmra.mrb[18].mxu0 %vm487_vm0, %v484_v22 }
 0x116   : > { %v1802_v26 = vpop.f32.mrb[0].mxu0 }
 0x117   : > { %v721_v29 = vmul.f32 %v1802_v26, %v2366_v25  ;;  %v614_v30 = vpop.f32.mrb[1].mxu0 }
 0x118   : > { %v720_v31 = vmul.f32 %v2366_v25, %v614_v30 }
 0x119   : > { %v748_v32 = vadd.f32 %v2371_v27, %v721_v29 }
 0x11a   : > { %v747_v33 = vadd.f32 %v2371_v27, %v720_v31  ;;  %v1805_v34 = vpop.f32.mrb[2].mxu0 }
 0x11b   : > { %v768_v35 = vmax.f32 %v748_v32, 0.0  ;;  %v723_v36 = vmul.f32 %v1805_v34, %v2366_v25  ;;  %v624_v37 = vpop.f32.mrb[3].mxu0 }
 0x11c   : > { %v767_v38 = vmax.f32 %v747_v33, 0.0  ;;  %v722_v39 = vmul.f32 %v2366_v25, %v624_v37 }
 0x11d   : > { %v797_v40 = vsel %vm793_vm1, %v768_v35, 0.0  ;;  %v750_v41 = vadd.f32 %v2371_v27, %v723_v36 }
 0x11e   : > { %v820_v42 = vmul.f32 0.0, %v797_v40  ;;  %v796_v43 = vsel %vm790_vm2, %v767_v38, 0.0  ;;  %v749_v44 = vadd.f32 %v2371_v27, %v722_v39  ;;  %v1808_v45 = vpop.f32.mrb[4].mxu0 }
 0x11f   : > { %v2390_v46 = vmul.f32 0.0, %v796_v43  ;;  %v770_v47 = vmax.f32 %v750_v41, 0.0  ;;  %v725_v48 = vmul.f32 %v1808_v45, %v2366_v25  ;;  %v634_v49 = vpop.f32.mrb[5].mxu0 }
 0x120   : > { %v769_v50 = vmax.f32 %v749_v44, 0.0  ;;  %v890_v51 = vrot.slane %v820_v42, 2  ;;  %v724_v52 = vmul.f32 %v2366_v25, %v634_v49  ;;  %v841_v58 = vrot.slane %v820_v42, 1 }
 0x121   : > { %v799_v53 = vsel %vm793_vm1, %v770_v47, 0.0  ;;  %v889_v54 = vrot.slane %v2390_v46, 2  ;;  %v752_v55 = vadd.f32 %v2371_v27, %v725_v48  ;;  %v840_v57 = vrot.slane %v2390_v46, 1 }
 0x122   : > { %v2400_v56 = vsel %vm790_vm2, %v769_v50, 0.0  ;;  %v751_v59 = vadd.f32 %v2371_v27, %v724_v52  ;;  %v1811_v60 = vpop.f32.mrb[6].mxu0  ;;  %v893_v61 = vrot.slane %v799_v53, 2  ;;  %v844_v3 = vrot.slane %v799_v53, 1 }
 0x123   : > { %938 = vrot.lane.b32.xlu0 %v2400_v56, %s2068_s12  ;;  %v891_v62 = vsel %vm888_vm3, %v889_v54, %v890_v51  ;;  %v892_v63 = vrot.slane %v2400_v56, 2  ;;  %v644_v0 = vpop.f32.mrb[7].mxu0  ;;  %v772_v1 = vmax.f32 %v752_v55, 0.0  ;;  %v842_v4 = vsel %vm839_vm4, %v840_v57, %v841_v58 }
 0x124   : > { %913 = vrot.lane.b32.xlu1 %v891_v62, %s2069_s26  ;;  %v771_v2 = vmax.f32 %v751_v59, 0.0  ;;  %v843_v21 = vrot.slane %v2400_v56, 1  ;;  %v727_v31 = vmul.f32 %v1811_v60, %v2366_v25  ;;  %v726_v33 = vmul.f32 %v2366_v25, %v644_v0 }
 0x125   : > { %v894_v23 = vsel %vm888_vm3, %v892_v63, %v893_v61  ;;  %v801_v29 = vsel %vm793_vm1, %v772_v1, 0.0 }
 0x126   : > { %v2411_v22 = vpop.f32.mrb[8].mxu0  ;;  %v2422_v30 = vsel %vm790_vm2, %v771_v2, 0.0  ;;  %v845_v32 = vsel %vm839_vm4, %v843_v21, %v844_v3  ;;  %v847_v36 = vrot.slane %v801_v29, 1  ;;  %v754_v38 = vadd.f32 %v2371_v27, %v727_v31 }
 0x127   : > { %864 = vrot.lane.b32.xlu0 %v842_v4, %s2070_s28  ;;  %v2415_v26 = vpop.f32.mrb[9].mxu0  ;;  %v846_v37 = vrot.slane %v2422_v30, 1  ;;  %v753_v39 = vadd.f32 %v2371_v27, %v726_v33  ;;  %v896_v47 = vrot.slane %v801_v29, 2  ;;  %v895_v49 = vrot.slane %v2422_v30, 2 }
 0x128   : > { %915 = vrot.lane.b32.xlu1 %v894_v23, %s2069_s26  ;;  %v774_v43 = vmax.f32 %v754_v38, 0.0 }
 0x129   : > { %v2440_v42 = vsel %vm839_vm4, %v846_v37, %v847_v36  ;;  %v773_v48 = vmax.f32 %v753_v39, 0.0  ;;  %v2463_v62 = vsel %vm888_vm3, %v895_v49, %v896_v47 }
 0x12a   : > { %v2427_v34 = vpop.f32.mrb[10].mxu0  ;;  %v2455_v57 = vsel %vm793_vm1, %v774_v43, 0.0  ;;  %v1168_v43 = vld [vmem:[%s2881_s3] sm:$0xff] }
 0x12b   : > { %866 = vrot.lane.b32.xlu0 %v845_v32, %s2070_s28  ;;  %v2430_v35 = vpop.f32.mrb[11].mxu0  ;;  %v2460_v61 = vsel %vm790_vm2, %v773_v48, 0.0 }
 0x12c   : > { %993 = vrot.lane.b32.xlu1 %v894_v23, %s2071_s16  ;;  %v850_v23 = vrot.slane %v2455_v57, 1  ;;  %v849_v38 = vrot.slane %v2460_v61, 1 }
 0x12e   : > { %v1820_v40 = vpop.f32.mrb[12].mxu0 }
 0x12f   : > { %966 = vrot.lane.b32.xlu0 %v845_v32, %s2072_s27  ;;  %v674_v41 = vpop.f32.mrb[13].mxu0  ;;  %v733_v44 = vmul.f32 %v1820_v40, %v2366_v25 }
 0x130   : > { %940 = vrot.lane.b32.xlu1 %v2422_v30, %s2068_s12  ;;  %v732_v45 = vmul.f32 %v2366_v25, %v674_v41 }
 0x131   : > { %v760_v51 = vadd.f32 %v2371_v27, %v733_v44  ;;  %v1169_v44 = vld [vmem:[%s2881_s3 + $0x8] sm:$0xff] }
 0x132   : > { %v1823_v50 = vpop.f32.mrb[14].mxu0  ;;  %v759_v52 = vadd.f32 %v2371_v27, %v732_v45  ;;  %v729_v45 = vmul.f32 %v2411_v22, %v2366_v25  ;;  %v1170_v22 = vld [vmem:[%s2881_s3 + $0x10] sm:$0xff] }
 0x133   : > { %968 = vrot.lane.b32.xlu0 %v2440_v42, %s2072_s27  ;;  %v735_v53 = vmul.f32 %v1823_v50, %v2366_v25  ;;  %v684_v54 = vpop.f32.mrb[15].mxu0  ;;  %v780_v58 = vmax.f32 %v760_v51, 0.0  ;;  %v728_v51 = vmul.f32 %v2366_v25, %v2415_v26 }
 0x134   : > { %1018 = vrot.lane.b32.xlu1 %v2422_v30, %s2073_s29  ;;  %v734_v55 = vmul.f32 %v2366_v25, %v684_v54  ;;  %v779_v59 = vmax.f32 %v759_v52, 0.0 }
 0x135   : > { %v762_v60 = vadd.f32 %v2371_v27, %v735_v53  ;;  %v2470_v1 = vsel %vm793_vm1, %v780_v58, 0.0  ;;  %v899_v58 = vrot.slane %v2455_v57, 2 }
 0x136   : > { %v761_v63 = vadd.f32 %v2371_v27, %v734_v55  ;;  %v1826_v0 = vpop.f32.mrb[16].mxu0  ;;  %v2474_v2 = vsel %vm790_vm2, %v779_v59, 0.0  ;;  %v908_v29 = vrot.slane %v2470_v1, 2  ;;  %v1171_v55 = vld [vmem:[%s2881_s3 + $0x18] sm:$0xff] }
 0x137   : > { %995 = vrot.lane.b32.xlu0 %v2463_v62, %s2071_s16  ;;  %v782_v3 = vmax.f32 %v762_v60, 0.0  ;;  %v737_v4 = vmul.f32 %v1826_v0, %v2366_v25  ;;  %v694_v21 = vpop.f32.mrb[17].mxu0  ;;  %v907_v33 = vrot.slane %v2474_v2, 2  ;;  %v1870_v60 = vpack.c.bf16 %v1169_v44, %v1168_v43  ;;  %v1172_v44 = vld [vmem:[%s2881_s3 + $0x20] sm:$0xf] }
 0x138   : > { %868 = vrot.lane.b32.xlu1 %v2440_v42, %s2070_s28  ;;  %v781_v31 = vmax.f32 %v761_v63, 0.0  ;;  %v736_v37 = vmul.f32 %v2366_v25, %v694_v21  ;;  %v851_v63 = vsel %vm839_vm4, %v849_v38, %v850_v23  ;;  %v898_v0 = vrot.slane %v2460_v61, 2 }
 0x139   : > { %v2483_v32 = vsel %vm793_vm1, %v782_v3, 0.0  ;;  %v764_v36 = vadd.f32 %v2371_v27, %v737_v4  ;;  %v2505_v47 = vsel %vm888_vm3, %v907_v33, %v908_v29  ;;  %1871 = vmatprep.subr.bf16.mxu1 %v1870_v60  ;;  %v755_v43 = vadd.f32 %v2371_v27, %v728_v51 }
 0x13a   : > { %v911_v39 = vrot.slane %v2483_v32, 2  ;;  %v2492_v40 = vsel %vm790_vm2, %v781_v31, 0.0  ;;  %v1829_v41 = vpop.f32.mrb[18].mxu0  ;;  %v763_v52 = vadd.f32 %v2371_v27, %v736_v37  ;;  %v1874_v31 = vpack.c.bf16 %v1171_v55, %v1170_v22  ;;  %1873 = vmatpush3.bf16.msra.mxu1 %v1870_v60 }
 0x13b   : > { %1020 = vrot.lane.b32.xlu0 %v2460_v61, %s2073_s29  ;;  %v910_v48 = vrot.slane %v2492_v40, 2  ;;  %v784_v49 = vmax.f32 %v764_v36, 0.0  ;;  %v704_v50 = vpop.f32.mrb[19].mxu0  ;;  %v739_v53 = vmul.f32 %v1829_v41, %v2366_v25  ;;  %v756_v36 = vadd.f32 %v2371_v27, %v729_v45 }
 0x13c   : > { %917 = vrot.lane.b32.xlu1 %v2463_v62, %s2069_s26  ;;  %v738_v54 = vmul.f32 %v2366_v25, %v704_v50  ;;  %v783_v3 = vmax.f32 %v763_v52, 0.0  ;;  %1875 = vmatprep.subr.bf16.mxu1 %v1874_v31  ;;  %v900_v41 = vsel %vm888_vm3, %v898_v0, %v899_v58  ;;  %v775_v58 = vmax.f32 %v755_v43, 0.0 }
 0x13d   : > { %v2523_v59 = vsel %vm888_vm3, %v910_v48, %v911_v39  ;;  %v813_v26 = vsel %vm793_vm1, %v784_v49, 0.0  ;;  %v766_v4 = vadd.f32 %v2371_v27, %v739_v53  ;;  %v776_v55 = vmax.f32 %v756_v36, 0.0 }
 0x13e   : > { %v964_v21 = vrot.slane %v813_v26, 1  ;;  %v991_v29 = vrot.slane %v813_v26, 2  ;;  %v765_v57 = vadd.f32 %v2371_v27, %v738_v54  ;;  %v2536_v23 = vsel %vm790_vm2, %v783_v3, 0.0  ;;  %1877 = vmatpush3.bf16.msra.mxu1 %v1874_v31 }
 0x13f   : > { %870 = vrot.lane.b32.xlu0 %v851_v63, %s2070_s28  ;;  %v786_v33 = vmax.f32 %v766_v4, 0.0  ;;  %v990_v38 = vrot.slane %v2536_v23, 2  ;;  %v963_v39 = vrot.slane %v2536_v23, 1  ;;  %1838 = vmatprep.subr.msk.mxu1 %vm1198_vm5, %v1172_v44  ;;  %v805_v60 = vsel %vm793_vm1, %v776_v55, 0.0 }
 0x140   : > { %1046 = vrot.lane.b32.xlu1 %v2440_v42, %s2074_s23  ;;  %v785_v37 = vmax.f32 %v765_v57, 0.0  ;;  %v2578_v0 = vsel %vm790_vm2, %v775_v58, 0.0  ;;  %v731_v3 = vmul.f32 %v2427_v34, %v2366_v25  ;;  %v730_v4 = vmul.f32 %v2366_v25, %v2430_v35 }
 0x141   : > { %v815_v42 = vsel %vm793_vm1, %v786_v33, 0.0  ;;  %v2550_v48 = vsel %vm888_vm3, %v990_v38, %v991_v29  ;;  %v2553_v49 = vsel %vm839_vm4, %v963_v39, %v964_v21  ;;  %v853_v21 = vrot.slane %v805_v60, 1 }
 0x142   : > { %v822_v45 = vmul.f32 0.0, %v815_v42  ;;  %v814_v50 = vsel %vm790_vm2, %v785_v37, 0.0  ;;  %1839 = vmatpush3.msk.msra.mxu1 %vm1198_vm5, %v1172_v44  ;;  %v852_v29 = vrot.slane %v2578_v0, 1  ;;  %v758_v57 = vadd.f32 %v2371_v27, %v731_v3 }
 0x143   : > { %919 = vrot.lane.b32.xlu0 %v900_v41, %s2069_s26  ;;  %v2559_v51 = vmul.f32 0.0, %v814_v50  ;;  %v757_v31 = vadd.f32 %v2371_v27, %v730_v4  ;;  %v902_v33 = vrot.slane %v805_v60, 2  ;;  %v901_v36 = vrot.slane %v2578_v0, 2 }
 0x144   : > { %1073 = vrot.lane.b32.xlu1 %v2463_v62, %s2075_s15  ;;  %v1044_v52 = vrot.slane %v822_v45, 1  ;;  %v1071_v53 = vrot.slane %v822_v45, 2  ;;  %v854_v34 = vsel %vm839_vm4, %v852_v29, %v853_v21  ;;  %v778_v25 = vmax.f32 %v758_v57, 0.0 }
 0x145   : > { %v1043_v54 = vrot.slane %v2559_v51, 1  ;;  %v1070_v22 = vrot.slane %v2559_v51, 2  ;;  %v777_v35 = vmax.f32 %v757_v31, 0.0  ;;  %v859_v42 = vrot.slane %v2470_v1, 1 }
 0x146   : > { %v807_v37 = vsel %vm793_vm1, %v778_v25, 0.0  ;;  %v858_v44 = vrot.slane %v2474_v2, 1  ;;  %v862_v1 = vrot.slane %v2483_v32, 1  ;;  %v861_v50 = vrot.slane %v2492_v40, 1 }
 0x147   : > { %1048 = vrot.lane.b32.xlu0 %v851_v63, %s2074_s23  ;;  %v2568_v62 = vsel %vm839_vm4, %v1043_v54, %v1044_v52  ;;  %v2571_v26 = vsel %vm888_vm3, %v1070_v22, %v1071_v53  ;;  %v2602_v27 = vsel %vm790_vm2, %v777_v35, 0.0  ;;  %v856_v38 = vrot.slane %v807_v37, 1 }
 0x148   : > { %942 = vrot.lane.b32.xlu1 %v2460_v61, %s2068_s12  ;;  %v855_v39 = vrot.slane %v2602_v27, 1  ;;  %v904_v43 = vrot.slane %v2602_v27, 2  ;;  %v860_v45 = vsel %vm839_vm4, %v858_v44, %v859_v42  ;;  %v863_v52 = vsel %vm839_vm4, %v861_v50, %v862_v1 }
 0x14a   : > { %v857_v28 = vsel %vm839_vm4, %v855_v39, %v856_v38 }
 0x14b   : > { %997 = vrot.lane.b32.xlu0 %v900_v41, %s2071_s16 }
 0x14c   : > { %970 = vrot.lane.b32.xlu1 %v851_v63, %s2072_s27  ;;  %v903_v63 = vsel %vm888_vm3, %v901_v36, %v902_v33 }
 0x14f   : > { %944 = vrot.lane.b32.xlu0 %v2578_v0, %s2068_s12 }
 0x150   : > { %1075 = vrot.lane.b32.xlu1 %v900_v41, %s2075_s15  ;;  %v905_v41 = vrot.slane %v807_v37, 2 }
 0x152   : > { %v906_v24 = vsel %vm888_vm3, %v904_v43, %v905_v41 }
 0x153   : > { %872 = vrot.lane.b32.xlu0 %v854_v34, %s2070_s28 }
 0x154   : > { %1022 = vrot.lane.b32.xlu1 %v2578_v0, %s2073_s29 }
 0x157   : > { %999 = vrot.lane.b32.xlu0 %v903_v63, %s2071_s16 }
 0x158   : > { %972 = vrot.lane.b32.xlu1 %v854_v34, %s2072_s27 }
 0x15b   : > { %1024 = vrot.lane.b32.xlu0 %v2602_v27, %s2073_s29 }
 0x15c   : > { %921 = vrot.lane.b32.xlu1 %v903_v63, %s2069_s26 }
 0x15f   : > { %874 = vrot.lane.b32.xlu0 %v857_v28, %s2070_s28 }
 0x160   : > { %1050 = vrot.lane.b32.xlu1 %v854_v34, %s2074_s23 }
 0x163   : > { %923 = vrot.lane.b32.xlu0 %v906_v24, %s2069_s26 }
 0x164   : > { %1077 = vrot.lane.b32.xlu1 %v903_v63, %s2075_s15 }
 0x167   : > { %1052 = vrot.lane.b32.xlu0 %v857_v28, %s2074_s23 }
 0x168   : > { %946 = vrot.lane.b32.xlu1 %v2602_v27, %s2068_s12 }
 0x16b   : > { %1001 = vrot.lane.b32.xlu0 %v906_v24, %s2071_s16 }
 0x16c   : > { %974 = vrot.lane.b32.xlu1 %v857_v28, %s2072_s27 }
 0x16f   : > { %948 = vrot.lane.b32.xlu0 %v2474_v2, %s2068_s12 }
 0x170   : > { %1079 = vrot.lane.b32.xlu1 %v906_v24, %s2075_s15 }
 0x173   : > { %876 = vrot.lane.b32.xlu0 %v860_v45, %s2070_s28 }
 0x174   : > { %1026 = vrot.lane.b32.xlu1 %v2474_v2, %s2073_s29 }
 0x177   : > { %1003 = vrot.lane.b32.xlu0 %v2505_v47, %s2071_s16 }
 0x178   : > { %976 = vrot.lane.b32.xlu1 %v860_v45, %s2072_s27 }
 0x17b   : > { %1028 = vrot.lane.b32.xlu0 %v2492_v40, %s2073_s29 }
 0x17c   : > { %925 = vrot.lane.b32.xlu1 %v2505_v47, %s2069_s26 }
 0x17f   : > { %878 = vrot.lane.b32.xlu0 %v863_v52, %s2070_s28 }
 0x180   : > { %1054 = vrot.lane.b32.xlu1 %v860_v45, %s2074_s23 }
 0x183   : > { %927 = vrot.lane.b32.xlu0 %v2523_v59, %s2069_s26 }
 0x184   : > { %1081 = vrot.lane.b32.xlu1 %v2505_v47, %s2075_s15 }
 0x187   : > { %1056 = vrot.lane.b32.xlu0 %v863_v52, %s2074_s23 }
 0x188   : > { %950 = vrot.lane.b32.xlu1 %v2492_v40, %s2068_s12 }
 0x18b   : > { %1083 = vrot.lane.b32.xlu0 %v2523_v59, %s2075_s15 }
 0x18c   : > { %978 = vrot.lane.b32.xlu1 %v863_v52, %s2072_s27 }
 0x18f   : > { %952 = vrot.lane.b32.xlu0 %v2536_v23, %s2068_s12  ;;  %s1697_s12 = sshll.u32 %s2250_s24, 6 }
 0x190   : > { %1005 = vrot.lane.b32.xlu1 %v2523_v59, %s2071_s16  ;;  %s2803_s28 = scalar_lea.vmem [#allocation5], %s1697_s12 }
 0x193   : > { %1030 = vrot.lane.b32.xlu0 %v2536_v23, %s2073_s29 }
 0x194   : > { %1007 = vrot.lane.b32.xlu1 %v2550_v48, %s2071_s16  ;;  %s1751_s16 = sshll.u32 %s2055_s20, 10  ;;  %s1565_s20 = scalar_lea.sflag [#allocation4], %s2250_s24 }
 0x195   : > { %v939_v32 = vpop.permute.xlu0 %938 }
 0x196   : > { %v914_v47 = vpop.permute.xlu1 %913 }
 0x197   : > { %980 = vrot.lane.b32.xlu0 %v2553_v49, %s2072_s27  ;;  %s1580_s27 = sshll.u32 %s2803_s28, 4  ;;  %s2824_s27 = int_to_ptr.vmem [resolvable:$true] %s1580_s27 }
 0x198   : > { %1032 = vrot.lane.b32.xlu1 %v2559_v51, %s2073_s29  ;;  %s1981_s25 = scalar_lea.vmem %s2824_s27, 1024 }
 0x199   : > { %v865_v53 = vpop.permute.xlu0 %864  ;;  %p1982_p8 = scmp.ne.s32.totalorder %s2824_s27, %s1981_s25 }
 0x19a   : > { %v916_v54 = vpop.permute.xlu1 %915 }
 0x19b   : > { %1058 = vrot.lane.b32.xlu0 %v2553_v49, %s2074_s23  ;;  %v1098_v49 = vsel %vm1097_vm6, %v2390_v46, %v865_v53  ;;  %p1983_p0 = pnand %p1982_p8, %p2902_p11 }
 0x19c   : > { %1060 = vrot.lane.b32.xlu1 %v2568_v62, %s2074_s23  ;;  %v1107_v62 = vsel %vm1106_vm7, %v1098_v49, %v914_v47  ;;  %s2822_s23 = scalar_lea.hbm %s2889_s11, %s1751_s16 }
 0x19d   : > { %v867_v59 = vpop.permute.xlu0 %866  ;;  %p1984_p6 = pneg %p1983_p0 }
 0x19e   : > { %v994_v23 = vpop.permute.xlu1 %993  ;;  %v1099_v63 = vsel %vm1097_vm6, %v2400_v56, %v867_v59 }
 0x19f   : > { %1085 = vrot.lane.b32.xlu0 %v2550_v48, %s2075_s15  ;;  %v1116_v48 = vsel %vm1115_vm8, %v1107_v62, %v939_v32  ;;  %v1108_v38 = vsel %vm1106_vm7, %v1099_v63, %v916_v54 }
 0x1a0   : > { %1087 = vrot.lane.b32.xlu1 %v2571_v26, %s2075_s15  ;;  %s1985_s15 = sshll.u32 %s2076_s14, 4  ;;  %s1986_s15 = int_to_ptr.vmem [resolvable:$false] %s1985_s15 }
 0x1a1   : > { %v967_v22 = vpop.permute.xlu0 %966  ;;  %s1987_s12 = scalar_lea.vmem %s1986_s15, 2048  ;;  %p1988_p13 = scmp.lt.s32.totalorder %s2824_s27, %s1986_s15 }
 0x1a2   : > { %v941_v55 = vpop.permute.xlu1 %940  ;;  %v1124_v26 = vsel %vm487_vm0, %v1116_v48, %v967_v22  ;;  %p1989_p2 = scmp.lt.s32.totalorder %s1987_s12, %s1981_s25 }
 0x1a3   : > { %v1133_v31 = vsel %vm1132_vm9, %v1124_v26, %v994_v23  ;;  %v1117_v41 = vsel %vm1115_vm8, %v1108_v38, %v941_v55 }
 0x1a4   : > { %p1990_p5 = por %p1989_p2, %p1988_p13 }
 0x1a5   : > { %v969_v58 = vpop.permute.xlu0 %968 }
 0x1a6   : > { %v1019_v51 = vpop.permute.xlu1 %1018  ;;  %v1125_v43 = vsel %vm487_vm0, %v1117_v41, %v969_v58  ;;  %p1991_p4 = pnand %p1990_p5, %p1984_p6 }
 0x1a7   : > { %v1142_v46 = vsel %vm1141_vm10, %v1133_v31, %v1019_v51 }
 0x1a9   : > { %v996_v60 = vpop.permute.xlu0 %995 }
 0x1aa   : > { %v869_v3 = vpop.permute.xlu1 %868  ;;  %v1134_v24 = vsel %vm1132_vm9, %v1125_v43, %v996_v60 }
 0x1ab   : > { %v1100_v54 = vsel %vm1097_vm6, %v2422_v30, %v869_v3 }
 0x1ad   : > { %v1021_v4 = vpop.permute.xlu0 %1020 }
 0x1ae   : > { %v918_v21 = vpop.permute.xlu1 %917  ;;  %v1143_v42 = vsel %vm1141_vm10, %v1134_v24, %v1021_v4 }
 0x1af   : > { %v1109_v23 = vsel %vm1106_vm7, %v1100_v54, %v918_v21 }
 0x1b1   : > { %v871_v29 = vpop.permute.xlu0 %870 }
 0x1b2   : > { %v1047_v57 = vpop.permute.xlu1 %1046  ;;  %v1101_v30 = vsel %vm1097_vm6, %v2460_v61, %v871_v29 }
 0x1b3   : > { %v1151_v34 = vsel %vm1150_vm11, %v1142_v46, %v1047_v57 }
 0x1b5   : > { %v920_v33 = vpop.permute.xlu0 %919 }
 0x1b6   : > { %v1074_v36 = vpop.permute.xlu1 %1073  ;;  %v1110_v3 = vsel %vm1106_vm7, %v1101_v30, %v920_v33 }
 0x1b7   : > { %v1160_v25 = vsel %vm1159_vm12, %v1151_v34, %v1074_v36 }
 0x1b8   : > { %1840 = vmatprep.mubr.msk.f32.mxu1 %vm1173_vm13, %v1160_v25 }
 0x1b9   : > { %v1049_v35 = vpop.permute.xlu0 %1048 }
 0x1ba   : > { %v943_v37 = vpop.permute.xlu1 %942  ;;  %v1152_v45 = vsel %vm1150_vm11, %v1143_v42, %v1049_v35 }
 0x1bb   : > { %v1118_v22 = vsel %vm1115_vm8, %v1109_v23, %v943_v37 }
 0x1bd   : > { %v998_v39 = vpop.permute.xlu0 %997 }
 0x1be   : > { %v971_v28 = vpop.permute.xlu1 %970 }
 0x1bf   : > { %v1126_v55 = vsel %vm487_vm0, %v1118_v22, %v971_v28 }
 0x1c0   : > { %v1135_v60 = vsel %vm1132_vm9, %v1126_v55, %v998_v39 }
 0x1c1   : > { %v945_v44 = vpop.permute.xlu0 %944 }
 0x1c2   : > { %v1076_v1 = vpop.permute.xlu1 %1075  ;;  %v1119_v57 = vsel %vm1115_vm8, %v1110_v3, %v945_v44 }
 0x1c3   : > { %v1161_v50 = vsel %vm1159_vm12, %v1152_v45, %v1076_v1 }
 0x1c4   : > { %1841 = vmatmul.mubr.msk.f32.vlgmr.msra.gmra.mrb[0].mxu1 %vm1173_vm13, %v1161_v50 }
 0x1c5   : > { %v873_v56 = vpop.permute.xlu0 %872 }
 0x1c6   : > { %v1023_v52 = vpop.permute.xlu1 %1022  ;;  %v1102_v43 = vsel %vm1097_vm6, %v2578_v0, %v873_v56 }
 0x1c7   : > { %v1144_v49 = vsel %vm1141_vm10, %v1135_v60, %v1023_v52 }
 0x1c9   : > { %v1000_v32 = vpop.permute.xlu0 %999 }
 0x1ca   : > { %v973_v47 = vpop.permute.xlu1 %972 }
 0x1cb   : > { %v1127_v46 = vsel %vm487_vm0, %v1119_v57, %v973_v47 }
 0x1cc   : > { %v1136_v36 = vsel %vm1132_vm9, %v1127_v46, %v1000_v32 }
 0x1cd   : > { %v1025_v53 = vpop.permute.xlu0 %1024 }
 0x1ce   : > { %v922_v59 = vpop.permute.xlu1 %921  ;;  %v1145_v35 = vsel %vm1141_vm10, %v1136_v36, %v1025_v53 }
 0x1cf   : > { %v1111_v42 = vsel %vm1106_vm7, %v1102_v43, %v922_v59 }
 0x1d1   : > { %v875_v58 = vpop.permute.xlu0 %874 }
 0x1d2   : > { %v1051_v51 = vpop.permute.xlu1 %1050  ;;  %v1103_v52 = vsel %vm1097_vm6, %v2602_v27, %v875_v58 }
 0x1d3   : > { %v1153_v4 = vsel %vm1150_vm11, %v1144_v49, %v1051_v51 }
 0x1d5   : > { %v924_v62 = vpop.permute.xlu0 %923 }
 0x1d6   : > { %v1078_v48 = vpop.permute.xlu1 %1077  ;;  %v1112_v32 = vsel %vm1106_vm7, %v1103_v52, %v924_v62 }
 0x1d7   : > { %v1162_v26 = vsel %vm1159_vm12, %v1153_v4, %v1078_v48 }
 0x1d8   : > { %1843 = vmatprep.mubr.msk.f32.mxu1 %vm1173_vm13, %v1162_v26 }
 0x1d9   : > { %v1053_v21 = vpop.permute.xlu0 %1052 }
 0x1da   : > { %v947_v31 = vpop.permute.xlu1 %946  ;;  %v1154_v37 = vsel %vm1150_vm11, %v1145_v35, %v1053_v21 }
 0x1db   : > { %v1120_v44 = vsel %vm1115_vm8, %v1111_v42, %v947_v31 }
 0x1dd   : > { %v1002_v34 = vpop.permute.xlu0 %1001 }
 0x1de   : > { %v975_v25 = vpop.permute.xlu1 %974 }
 0x1df   : > { %v1128_v45 = vsel %vm487_vm0, %v1120_v44, %v975_v25  ;;  %v1345_v44 = vld [vmem:[%s2882_s4] sm:$0xf] }
 0x1e0   : > { %v1137_v47 = vsel %vm1132_vm9, %v1128_v45, %v1002_v34  ;;  %1852 = vmatprep.subr.msk.mxu1 %vm1198_vm5, %v1345_v44  ;;  %v1731_v45 = vld [vmem:[%s2885_s7] ss:$0 sm:$0xff] }
 0x1e1   : > { %v949_v63 = vpop.permute.xlu0 %948  ;;  %1853 = vmatpush3.msk.msra.mxu1 %vm1198_vm5, %v1345_v44  ;;  %v1496_v44 = vrot.slane %v2336_v17, 1 }
 0x1e2   : > { %v1080_v61 = vpop.permute.xlu1 %1079  ;;  %v1121_v53 = vsel %vm1115_vm8, %v1112_v32, %v949_v63 }
 0x1e3   : > { %v1163_v29 = vsel %vm1159_vm12, %v1154_v37, %v1080_v61 }
 0x1e4   : > { %1844 = vmatmul.mubr.msk.f32.gmra.mrb[2].mxu1 %vm1173_vm13, %v1163_v29 }
 0x1e5   : > { %v877_v33 = vpop.permute.xlu0 %876 }
 0x1e6   : > { %v1027_v38 = vpop.permute.xlu1 %1026  ;;  %v1104_v36 = vsel %vm1097_vm6, %v2474_v2, %v877_v33 }
 0x1e7   : > { %v1146_v0 = vsel %vm1141_vm10, %v1137_v47, %v1027_v38 }
 0x1e9   : > { %v1004_v39 = vpop.permute.xlu0 %1003 }
 0x1ea   : > { %v977_v41 = vpop.permute.xlu1 %976 }
 0x1eb   : > { %v1129_v54 = vsel %vm487_vm0, %v1121_v53, %v977_v41 }
 0x1ec   : > { %v1138_v27 = vsel %vm1132_vm9, %v1129_v54, %v1004_v39 }
 0x1ed   : > { %v1029_v28 = vpop.permute.xlu0 %1028 }
 0x1ee   : > { %v926_v24 = vpop.permute.xlu1 %925  ;;  %v1147_v51 = vsel %vm1141_vm10, %v1138_v27, %v1029_v28 }
 0x1ef   : > { %v1113_v35 = vsel %vm1106_vm7, %v1104_v36, %v926_v24 }
 0x1f1   : > { %v879_v1 = vpop.permute.xlu0 %878 }
 0x1f2   : > { %v1055_v50 = vpop.permute.xlu1 %1054  ;;  %v1105_v21 = vsel %vm1097_vm6, %v2492_v40, %v879_v1 }
 0x1f3   : > { %v1155_v59 = vsel %vm1150_vm11, %v1146_v0, %v1055_v50  ;;  %v1732_v50 = vld [vmem:[%s2886_s8] ss:$0 sm:$0xff] }
 0x1f5   : > { %v928_v56 = vpop.permute.xlu0 %927 }
 0x1f6   : > { %v1082_v23 = vpop.permute.xlu1 %1081  ;;  %v1114_v57 = vsel %vm1106_vm7, %v1105_v21, %v928_v56 }
 0x1f7   : > { %v1164_v22 = vsel %vm1159_vm12, %v1155_v59, %v1082_v23 }
 0x1f8   : > { %1846 = vmatprep.mubr.msk.f32.mxu1 %vm1173_vm13, %v1164_v22 }
 0x1f9   : > { %v1057_v55 = vpop.permute.xlu0 %1056 }
 0x1fa   : > { %v951_v58 = vpop.permute.xlu1 %950  ;;  %v1156_v60 = vsel %vm1150_vm11, %v1147_v51, %v1057_v55 }
 0x1fb   : > { %v1122_v63 = vsel %vm1115_vm8, %v1113_v35, %v951_v58 }
 0x1fd   : > { %v1084_v49 = vpop.permute.xlu0 %1083 }
 0x1fe   : > { %v1165_v62 = vsel %vm1159_vm12, %v1156_v60, %v1084_v49  ;;  %v979_v4 = vpop.permute.xlu1 %978 }
 0x1ff   : > { %1847 = vmatmul.mubr.msk.f32.gmra.mrb[4].mxu1 %vm1173_vm13, %v1165_v62  ;;  %v1130_v61 = vsel %vm487_vm0, %v1122_v63, %v979_v4 }
 0x201   : > { %v953_v48 = vpop.permute.xlu0 %952 }
 0x202   : > { %v1006_v26 = vpop.permute.xlu1 %1005  ;;  %v1123_v46 = vsel %vm1115_vm8, %v1114_v57, %v953_v48 }
 0x203   : > { %v1139_v38 = vsel %vm1132_vm9, %v1130_v61, %v1006_v26  ;;  %v1482_v61 = vrot.slane %v2293_v8, 1  ;;  %v1484_v8 = vrot.slane %v2296_v9, 1  ;;  %v1500_v9 = vrot.slane %v2353_v20, 1 }
 0x205   : > { %v1031_v30 = vpop.permute.xlu0 %1030 }
 0x206   : > { %v1008_v3 = vpop.permute.xlu1 %1007  ;;  %v1148_v39 = vsel %vm1141_vm10, %v1139_v38, %v1031_v30  ;;  %v1479_v38 = vrot.slane %v2283_v6, 1 }
 0x209   : > { %v981_v31 = vpop.permute.xlu0 %980 }
 0x20a   : > { %v1033_v34 = vpop.permute.xlu1 %1032  ;;  %v1131_v25 = vsel %vm487_vm0, %v1123_v46, %v981_v31 }
 0x20b   : > { %v1140_v40 = vsel %vm1132_vm9, %v1131_v25, %v1008_v3 }
 0x20c   : > { %v1149_v41 = vsel %vm1141_vm10, %v1140_v40, %v1033_v34 }
 0x20d   : > { %v1059_v37 = vpop.permute.xlu0 %1058 }
 0x20e   : > { %v1061_v29 = vpop.permute.xlu1 %1060  ;;  %v1157_v2 = vsel %vm1150_vm11, %v1148_v39, %v1059_v37  ;;  %v1481_v37 = vrot.slane %v2286_v7, 1 }
 0x20f   : > { %v1158_v28 = vsel %vm1150_vm11, %v1149_v41, %v1061_v29  ;;  %v1478_v29 = vrot.slane %v2277_v5, 1  ;;  %v1487_v41 = vrot.slane %v2306_v11, 1  ;;  %v1494_v5 = vrot.slane %v2333_v16, 1 }
 0x210   : > { %v1483_v40 = vsel %vm839_vm4, %v1481_v37, %v1482_v61  ;;  %v1491_v11 = vrot.slane %v2323_v14, 1  ;;  %v1743_v14 = vld [vmem:[%s2888_s10] ss:$0 sm:$0xff] }
 0x211   : > { %v1086_v33 = vpop.permute.xlu0 %1085  ;;  %v1480_v39 = vsel %vm839_vm4, %v1478_v29, %v1479_v38 }
 0x212   : > { %v1166_v43 = vsel %vm1159_vm12, %v1157_v2, %v1086_v33  ;;  %v1088_v24 = vpop.permute.xlu1 %1087  ;;  %v1488_v2 = vrot.slane %v2313_v12, 1  ;;  %v1485_v33 = vrot.slane %v2303_v10, 1 }
 0x213   : > { %v1167_v42 = vsel %vm1159_vm12, %v1158_v28, %v1088_v24  ;;  %1849 = vmatprep.mubr.msk.f32.mxu1 %vm1173_vm13, %v1166_v43  ;;  %v1493_v43 = vrot.slane %v2326_v15, 1  ;;  %v1490_v24 = vrot.slane %v2316_v13, 1  ;;  %v1497_v15 = vrot.slane %v2343_v18, 1  ;;  %v1742_v13 = vld [vmem:[%s2887_s9] ss:$0 sm:$0xff] }
 0x214   : > { %1850 = vmatmul.mubr.msk.f32.gmra.mrb[6].mxu1 %vm1173_vm13, %v1167_v42  ;;  %v1489_v7 = vsel %vm839_vm4, %v1487_v41, %v1488_v2  ;;  %v1486_v28 = vsel %vm839_vm4, %v1484_v8, %v1485_v33  ;;  %v1499_v42 = vrot.slane %v2346_v19, 1 }
 0x215   : > { %v1495_v6 = vsel %vm839_vm4, %v1493_v43, %v1494_v5  ;;  %v1492_v12 = vsel %vm839_vm4, %v1490_v24, %v1491_v11  ;;  %v1498_v16 = vsel %vm839_vm4, %v1496_v44, %v1497_v15 }
 0x216   : > { %v1501_v10 = vsel %vm839_vm4, %v1499_v42, %v1500_v9 }
 0x297   : > { %v1842_v1 = vpop.f32.mrb[0].mxu1 }
 0x298   : > { %v1315_v52 = vmul.f32 %v1842_v1, %v1731_v45  ;;  %v1268_v32 = vpop.f32.mrb[1].mxu1 }
 0x299   : > { %v1314_v47 = vmul.f32 %v1731_v45, %v1268_v32 }
 0x29a   : > { %v1330_v53 = vadd.f32 %v1732_v50, %v1315_v52 }
 0x29b   : > { %v1329_v0 = vadd.f32 %v1732_v50, %v1314_v47 }
 0x29c   : > { %v1338_v54 = vmax.f32 %v1330_v53, 0.0 }
 0x29d   : > { %v1337_v56 = vmax.f32 %v1329_v0, 0.0 }
 0x29f   : > { %1854 = vmatprep.mubr.msk.f32.mxu1 %vm1097_vm6, %v1337_v56 }
 0x2a0   : > { %1855 = vmatmul.mubr.msk.f32.vlgmr.msra.gmra.mrb[8].mxu1 %vm1097_vm6, %v1338_v54 }
 0x2b7   : > { %v1845_v59 = vpop.f32.mrb[2].mxu1 }
 0x2b8   : > { %v1317_v23 = vmul.f32 %v1845_v59, %v1731_v45  ;;  %v1278_v22 = vpop.f32.mrb[3].mxu1 }
 0x2b9   : > { %v1316_v27 = vmul.f32 %v1731_v45, %v1278_v22 }
 0x2ba   : > { %v1332_v55 = vadd.f32 %v1732_v50, %v1317_v23 }
 0x2bb   : > { %v1331_v58 = vadd.f32 %v1732_v50, %v1316_v27 }
 0x2bc   : > { %v1340_v60 = vmax.f32 %v1332_v55, 0.0 }
 0x2bd   : > { %v1339_v51 = vmax.f32 %v1331_v58, 0.0 }
 0x2bf   : > { %1857 = vmatprep.mubr.msk.f32.mxu1 %vm1097_vm6, %v1339_v51 }
 0x2c0   : > { %1858 = vmatmul.mubr.msk.f32.gmra.mrb[10].mxu1 %vm1097_vm6, %v1340_v60 }
 0x2d2   : > { %v1848_v49 = vpop.f32.mrb[4].mxu1 }
 0x2d3   : > { %v1319_v62 = vmul.f32 %v1848_v49, %v1731_v45  ;;  %v1288_v4 = vpop.f32.mrb[5].mxu1 }
 0x2d4   : > { %v1318_v48 = vmul.f32 %v1731_v45, %v1288_v4 }
 0x2d5   : > { %v1334_v26 = vadd.f32 %v1732_v50, %v1319_v62 }
 0x2d6   : > { %v1333_v30 = vadd.f32 %v1732_v50, %v1318_v48 }
 0x2d7   : > { %v1342_v21 = vmax.f32 %v1334_v26, 0.0 }
 0x2d8   : > { %v1341_v3 = vmax.f32 %v1333_v30, 0.0 }
 0x2da   : > { %1860 = vmatprep.mubr.msk.f32.mxu1 %vm1097_vm6, %v1341_v3 }
 0x2db   : > { %1861 = vmatmul.mubr.msk.f32.gmra.mrb[12].mxu1 %vm1097_vm6, %v1342_v21 }
 0x2e7   : > { %v1851_v57 = vpop.f32.mrb[6].mxu1 }
 0x2e8   : > { %v1321_v31 = vmul.f32 %v1851_v57, %v1731_v45  ;;  %v1298_v46 = vpop.f32.mrb[7].mxu1 }
 0x2e9   : > { %v1320_v34 = vmul.f32 %v1731_v45, %v1298_v46 }
 0x2ea   : > { %v1336_v36 = vadd.f32 %v1732_v50, %v1321_v31 }
 0x2eb   : > { %v1335_v25 = vadd.f32 %v1732_v50, %v1320_v34 }
 0x2ec   : > { %v1344_v63 = vmax.f32 %v1336_v36, 0.0 }
 0x2ed   : > { %v1343_v35 = vmax.f32 %v1335_v25, 0.0 }
 0x2ef   : > { %1863 = vmatprep.mubr.msk.f32.mxu1 %vm1097_vm6, %v1343_v35 }
 0x2f0   : > { %1864 = vmatmul.mubr.msk.f32.gmra.mrb[14].mxu1 %vm1097_vm6, %v1344_v63 }
 0x373   : > { %v1856_v45 = vpop.f32.mrb[8].mxu1 }
 0x374   : > { %v1518_v19 = vmul.f32 %v1856_v45, %v1742_v13  ;;  %v1439_v1 = vpop.f32.mrb[9].mxu1 }
 0x375   : > { %v1517_v20 = vmul.f32 %v1742_v13, %v1439_v1 }
 0x376   : > { %v1533_v50 = vadd.f32 %v1743_v14, %v1518_v19 }
 0x377   : > { %v1532_v52 = vadd.f32 %v1743_v14, %v1517_v20 }
 0x378   : > { %v1541_v17 = vadd.f32 %v1533_v50, %v1483_v40 }
 0x379   : > { %v1540_v32 = vadd.f32 %v1532_v52, %v1480_v39 }
 0x37a   : > { %v1549_v18 = vmax.f32 %v1541_v17, 0.0 }
 0x37b   : > { %v1548_v47 = vmax.f32 %v1540_v32, 0.0 }
 0x37c   : > { %1557 = vst.msk [vmem:[%s2803_s28 + $0x8] sm:$0xff] %vm487_vm0, %v1549_v18 }
 0x37d   : > { %1556 = vst.msk [vmem:[%s2803_s28] sm:$0xff] %vm487_vm0, %v1548_v47 }
 0x393   : > { %v1859_v53 = vpop.f32.mrb[10].mxu1 }
 0x394   : > { %v1520_v0 = vmul.f32 %v1859_v53, %v1742_v13  ;;  %v1449_v56 = vpop.f32.mrb[11].mxu1 }
 0x395   : > { %v1519_v54 = vmul.f32 %v1742_v13, %v1449_v56 }
 0x396   : > { %v1535_v59 = vadd.f32 %v1743_v14, %v1520_v0 }
 0x397   : > { %v1534_v23 = vadd.f32 %v1743_v14, %v1519_v54 }
 0x398   : > { %v1543_v22 = vadd.f32 %v1535_v59, %v1489_v7 }
 0x399   : > { %v1542_v27 = vadd.f32 %v1534_v23, %v1486_v28 }
 0x39a   : > { %v1551_v55 = vmax.f32 %v1543_v22, 0.0 }
 0x39b   : > { %v1550_v58 = vmax.f32 %v1542_v27, 0.0 }
 0x39c   : > { %1559 = vst.msk [vmem:[%s2803_s28 + $0x18] sm:$0xff] %vm487_vm0, %v1551_v55 }
 0x39d   : > { %1558 = vst.msk [vmem:[%s2803_s28 + $0x10] sm:$0xff] %vm487_vm0, %v1550_v58 }
 0x3ae   : > { %v1862_v51 = vpop.f32.mrb[12].mxu1 }
 0x3af   : > { %v1522_v60 = vmul.f32 %v1862_v51, %v1742_v13  ;;  %v1459_v49 = vpop.f32.mrb[13].mxu1 }
 0x3b0   : > { %v1521_v62 = vmul.f32 %v1742_v13, %v1459_v49 }
 0x3b1   : > { %v1537_v4 = vadd.f32 %v1743_v14, %v1522_v60 }
 0x3b2   : > { %v1536_v48 = vadd.f32 %v1743_v14, %v1521_v62 }
 0x3b3   : > { %v1545_v26 = vadd.f32 %v1537_v4, %v1495_v6 }
 0x3b4   : > { %v1544_v30 = vadd.f32 %v1536_v48, %v1492_v12 }
 0x3b5   : > { %v1553_v3 = vmax.f32 %v1545_v26, 0.0 }
 0x3b6   : > { %v1552_v21 = vmax.f32 %v1544_v30, 0.0 }
 0x3b7   : > { %1561 = vst.msk [vmem:[%s2803_s28 + $0x28] sm:$0xff] %vm487_vm0, %v1553_v3 }
 0x3b8   : > { %1560 = vst.msk [vmem:[%s2803_s28 + $0x20] sm:$0xff] %vm487_vm0, %v1552_v21 }
 0x3c3   : > { %v1865_v57 = vpop.f32.mrb[14].mxu1 }
 0x3c4   : > { %v1524_v31 = vmul.f32 %v1865_v57, %v1742_v13  ;;  %v1469_v46 = vpop.f32.mrb[15].mxu1 }
 0x3c5   : > { %v1523_v34 = vmul.f32 %v1742_v13, %v1469_v46 }
 0x3c6   : > { %v1539_v36 = vadd.f32 %v1743_v14, %v1524_v31 }
 0x3c7   : > { %v1538_v25 = vadd.f32 %v1743_v14, %v1523_v34 }
 0x3c8   : > { %v1547_v35 = vadd.f32 %v1539_v36, %v1501_v10 }
 0x3c9   : > { %v1546_v63 = vadd.f32 %v1538_v25, %v1498_v16 }
 0x3ca   : > { %v1555_v37 = vmax.f32 %v1547_v35, 0.0 }
 0x3cb   : > { %v1554_v61 = vmax.f32 %v1546_v63, 0.0 }
 0x3cc   : > { %1563 = vst.msk [vmem:[%s2803_s28 + $0x38] sm:$0xff] %vm487_vm0, %v1555_v37 }
 0x3cd   : > { %1562 = vst.msk [vmem:[%s2803_s28 + $0x30] sm:$0xff] %vm487_vm0, %v1554_v61 }
 0x3ce   : > { %1994 = shalt.err (!%p1991_p4)
}
 0x3cf   : > { %s1995_s28 = scalar_lea.hbm %s2822_s23, 1024  ;;  %s1999_s21 = scalar_lea.hbm %s2889_s11, 2048 }
 0x3d0   : > { %p1996_p7 = scmp.ne.s32.totalorder %s2822_s23, %s1995_s28  ;;  %p2000_p1 = scmp.lt.u32.totalorder %s2822_s23, %s2889_s11 }
 0x3d1   : > { %p2001_p3 = scmp.lt.u32.totalorder %s1999_s21, %s1995_s28  ;;  %p2003_p8 = scmp.lt.u32.totalorder %s1995_s28, %s2822_s23 }
 0x3d2   : > { %p1997_p10 = pnand %p1996_p7, %p2902_p11 }
 0x3d3   : > { %p2002_p9 = por %p2001_p3, %p2000_p1 }
 0x3d4   : > { %p1998_p12 = pneg %p1997_p10 }
 0x3d5   : > { %p2004_p0 = por %p2003_p8, %p2002_p9 }
 0x3d7   : > { %p2005_p6 = pnand %p2004_p0, %p1998_p12 }
 0x3d9   : > { %2008 = shalt.err (!%p2005_p6)
}
 0x3da   : > { %s2077_s25 = smov 128  }
 0x3db   : > { %1880 = dma.vmem_to_hbm [thread:$0]  (%p2902_p11), %s2824_s27, 1024, %s2822_s23, %s1565_s20, %s2077_s25, %s2077_s25, %s2069_s26  }
 0x3dc PF: > { %s1595_s12 = sand.u32 1, %s2043_s17   ;;  %p2903_p13 = scmp.ne.s32.totalorder %s2899_s13, 0 }
 0x3dd   : > { %p2904_p2 = scmp.ge.s32.totalorder %s2063_s22, 2  ;;  %s1596_s28 = scalar_lea.sflag [#allocation4], %s1595_s12 }
 0x3df   : > { %p1887_p5 = pnand %p2904_p2, %p2903_p13 }
 0x3e1   : > { %2038 = dma.done.wait (!%p1887_p5), %s1596_s28, 1024  }
 0x3e2   : > { %2040 = vsyncadd (!%p1887_p5), %s1596_s28, 4294966272  ;;  %s27_s22 = sadd.s32 1, %s2063_s22   ;;  %s2905_s30 = sld [smem:[#allocation10_spill]] }
 0x3e3   : > { %p24_p4 = scmp.ge.s32.totalorder %s27_s22, 4   ;;  %s2906_s20 = sld [smem:[#allocation8_spill]] }
 0x3e4   : > { %s2907_s21 = sld [smem:[#allocation9_spill]]  ;;  %s2908_s17 = smov %s2047_s18 }
 0x3e5   : > { %s2909_s18 = smov %s2051_s19  ;;  %26 = sbr.rel (!%p24_p4) target bundleno = 6 (0x6), region = 112 }
 0x3e8   : > { %s2910_s19 = smov %s2905_s30 }
 0x3ec   :  { %1601 = vsyncpa [#allocation3], 1 }
 0x3ed   :  { %1603 = vsyncpa [#allocation3 + $0x1], 1 }
 0x3ee   :  { %1604 = vsyncpa [#allocation4], 1 }
 0x3ef   :  { %1606 = vsyncpa [#allocation4 + $0x1], 1 }

</bundles_post_ra>
